<compile_context>
chip_gen: v7x
topology: tpu7x:2x2x1
jax: 0.10.0
libtpu: 0.0.40
codegen_flags: <defaults>
</compile_context>

<pallas_src>
import functools
import math

import jax
import jax.numpy as jnp
from jax.experimental import pallas as pl

# ----------------------------- model config (small, synthetic) ---------------
VOCAB = 50
VOCAB_PAD = 64         # vocab table padded to a multiple of 8 sublanes
MAX_POS = 16
TYPE_VOCAB = 2
HIDDEN = 32
N_HEADS = 2
HEAD_DIM = HIDDEN // N_HEADS
INTERMEDIATE = 64
N_LAYERS = 2
NUM_CLASSES = 29
CLS_PAD = 128          # classifier output padded to a full lane width
THRESHOLD = 0.5
LN_EPS = 1e-12         # BERT layer-norm eps
ATTN_SCALE = 1.0 / math.sqrt(HEAD_DIM)


# ----------------------------- in-kernel helpers ------------------------------
def _mm(a, w_bf16):
    # bf16 MXU operands (weight already bf16), f32 accumulation.
    return jnp.dot(a.astype(jnp.bfloat16), w_bf16, preferred_element_type=jnp.float32)


def _layernorm(y, g, b):
    mean = jnp.mean(y, axis=-1, keepdims=True)
    var = jnp.mean((y - mean) * (y - mean), axis=-1, keepdims=True)
    return (y - mean) * jax.lax.rsqrt(var + LN_EPS) * g + b


def _gelu(y):
    # tanh-approximate gelu (EUP tanh)
    return 0.5 * y * (1.0 + jnp.tanh(0.7978845608028654 * (y + 0.044715 * y * y * y)))


# ----------------------------- fused whole-model kernel -----------------------
def _model_kernel(B, S,
                  ids_ref, tt_ref, mask_ref,
                  wemb_ref, pemb_ref, temb_ref,
                  eg_ref, eb_ref,
                  wqkv_ref, bqkv_ref, wo_ref, bo_ref,
                  ln1g_ref, ln1b_ref,
                  w1_ref, b1_ref, w2_ref, b2_ref,
                  ln2g_ref, ln2b_ref,
                  clsw_ref, clsb_ref,
                  prob_ref):
    T = B * S  # folded batch*sequence rows

    # ---- embeddings (gather-free, fully in-kernel) ----
    # word: one-hot (T, VOCAB_PAD) built on the VPU, single f32 MXU matmul
    vocab_iota = jax.lax.broadcasted_iota(jnp.int32, (T, VOCAB_PAD), 1)
    onehot = (ids_ref[...] == vocab_iota).astype(jnp.float32)            # (T, VOCAB_PAD)
    x = jnp.dot(onehot, wemb_ref[...], preferred_element_type=jnp.float32)  # (T, H)
    # positions: rows 0..S-1 tiled per batch element (static slices, no gather)
    pos_block = pemb_ref[0:S, :]                                         # (S, H)
    x = x + jnp.concatenate([pos_block] * B, axis=0)                     # (T, H)
    # token types: TYPE_VOCAB == 2 -> a single VPU select
    x = x + jnp.where(tt_ref[...] == 0, temb_ref[0:1, :], temb_ref[1:2, :])
    x = _layernorm(x, eg_ref[...], eb_ref[...])                          # embedding LN

    add_mask = mask_ref[...]                                             # (T, T) additive

    for l in range(N_LAYERS):
        # ---- self-attention (fused QKV projection, batch handled via block-diag mask) ----
        qkv = _mm(x, wqkv_ref[l]) + bqkv_ref[l]                          # (T, 3H)

        s_list = []
        for h in range(N_HEADS):
            qh = qkv[:, h * HEAD_DIM:(h + 1) * HEAD_DIM]
            kh = qkv[:, HIDDEN + h * HEAD_DIM:HIDDEN + (h + 1) * HEAD_DIM]
            s = jax.lax.dot_general(
                qh.astype(jnp.bfloat16), kh.astype(jnp.bfloat16),
                (((1,), (1,)), ((), ())),
                preferred_element_type=jnp.float32)                      # (T, T)
            s_list.append(s * ATTN_SCALE + add_mask)

        # batched softmax over both heads: one max/exp/sum/reciprocal chain
        s_all = jnp.concatenate(s_list, axis=0)                          # (N_HEADS*T, T)
        s_all = s_all - jnp.max(s_all, axis=-1, keepdims=True)
        p_all = jnp.exp(s_all)
        p_all = p_all * pl.reciprocal(jnp.sum(p_all, axis=-1, keepdims=True), approx=True)

        ctx_list = []
        for h in range(N_HEADS):
            ph = p_all[h * T:(h + 1) * T, :]
            vh = qkv[:, 2 * HIDDEN + h * HEAD_DIM:2 * HIDDEN + (h + 1) * HEAD_DIM]
            ctx_list.append(jnp.dot(ph.astype(jnp.bfloat16), vh.astype(jnp.bfloat16),
                                    preferred_element_type=jnp.float32))  # (T, dH)

        # fused output projection: concat heads, single (T,H)x(H,H) matmul
        ctx = jnp.concatenate(ctx_list, axis=-1)                         # (T, H)
        attn = _mm(ctx, wo_ref[l]) + bo_ref[l]
        x = _layernorm(attn + x, ln1g_ref[l], ln1b_ref[l])

        # ---- FFN ----
        ffn_h = _gelu(_mm(x, w1_ref[l]) + b1_ref[l])                     # (T, I)
        y = _mm(ffn_h, w2_ref[l]) + b2_ref[l]                            # (T, H)
        x = _layernorm(y + x, ln2g_ref[l], ln2b_ref[l])

    # ---- classifier head (lane-padded, unmasked stores) ----
    logits = _mm(x, clsw_ref[...]) + clsb_ref[...]                       # (T, CLS_PAD)
    prob_ref[...] = jax.nn.sigmoid(logits)


def fused_model(params, ids_flat, tt_flat, add_mask, B, S):
    T = B * S
    # Single invocation (grid=()): every array is a whole-block VMEM resident;
    # total footprint is ~0.2 MiB, far under the scoped VMEM limit on all generations.
    probs_pad = pl.pallas_call(
        functools.partial(_model_kernel, B, S),
        out_shape=jax.ShapeDtypeStruct((T, CLS_PAD), jnp.float32),
    )(ids_flat, tt_flat, add_mask,
      params["word_emb"], params["pos_emb"], params["type_emb"],
      params["emb_ln_g"], params["emb_ln_b"],
      params["wqkv"], params["bqkv"], params["wo"], params["bo"],
      params["ln1_g"], params["ln1_b"],
      params["w1"], params["b1"], params["w2"], params["b2"],
      params["ln2_g"], params["ln2_b"],
      params["cls_w"], params["cls_b"])
    return probs_pad


# ----------------------------- parameter construction ------------------------
def init_params(key):
    def normal(k, shape):
        return 0.02 * jax.random.normal(k, shape, dtype=jnp.float32)

    ks = jax.random.split(key, 8)

    word_emb = jnp.zeros((VOCAB_PAD, HIDDEN), jnp.float32)
    word_emb = word_emb.at[:VOCAB].set(normal(ks[0], (VOCAB, HIDDEN)))

    cls_w = jnp.zeros((HIDDEN, CLS_PAD), jnp.float32)
    cls_w = cls_w.at[:, :NUM_CLASSES].set(normal(ks[3], (HIDDEN, NUM_CLASSES)))

    bf16 = jnp.bfloat16
    return {
        # embedding tables stay f32 (embedding precision as before)
        "word_emb": word_emb,
        "pos_emb": normal(ks[1], (MAX_POS, HIDDEN)),
        "type_emb": normal(ks[2], (TYPE_VOCAB, HIDDEN)),
        "emb_ln_g": jnp.ones((1, HIDDEN), jnp.float32),
        "emb_ln_b": jnp.zeros((1, HIDDEN), jnp.float32),
        # matmul weights pre-cast to bf16 (MXU operands); biases / LN params stay f32
        "cls_w": cls_w.astype(bf16),
        "cls_b": jnp.zeros((1, CLS_PAD), jnp.float32),
        "wqkv": normal(ks[4], (N_LAYERS, HIDDEN, 3 * HIDDEN)).astype(bf16),
        "bqkv": jnp.zeros((N_LAYERS, 1, 3 * HIDDEN), jnp.float32),
        "wo": normal(ks[5], (N_LAYERS, HIDDEN, HIDDEN)).astype(bf16),
        "bo": jnp.zeros((N_LAYERS, 1, HIDDEN), jnp.float32),
        "ln1_g": jnp.ones((N_LAYERS, 1, HIDDEN), jnp.float32),
        "ln1_b": jnp.zeros((N_LAYERS, 1, HIDDEN), jnp.float32),
        "w1": normal(ks[6], (N_LAYERS, HIDDEN, INTERMEDIATE)).astype(bf16),
        "b1": jnp.zeros((N_LAYERS, 1, INTERMEDIATE), jnp.float32),
        "w2": normal(ks[7], (N_LAYERS, INTERMEDIATE, HIDDEN)).astype(bf16),
        "b2": jnp.zeros((N_LAYERS, 1, HIDDEN), jnp.float32),
        "ln2_g": jnp.ones((N_LAYERS, 1, HIDDEN), jnp.float32),
        "ln2_b": jnp.zeros((N_LAYERS, 1, HIDDEN), jnp.float32),
    }


# ----------------------------- forward pass -----------------------------------
def n2c2_forward(params, input_ids, attention_mask, token_type_ids=None):
    B, S = input_ids.shape
    if token_type_ids is None:
        token_type_ids = jnp.zeros_like(input_ids)

    ids_flat = input_ids.reshape(B * S, 1).astype(jnp.int32)
    tt_flat = token_type_ids.reshape(B * S, 1).astype(jnp.int32)

    # Precomputed additive attention mask over the folded (B*S) token axis:
    # 0 where (same batch element AND key is a real token), -10000 otherwise
    # (cross-batch entries underflow to exactly 0 after softmax -> per-batch semantics).
    row_batch = jnp.repeat(jnp.arange(B), S)                          # (B*S,)
    same_batch = row_batch[:, None] == row_batch[None, :]             # (B*S, B*S)
    key_valid = attention_mask.reshape(B * S) > 0                     # (B*S,)
    allowed = same_batch & key_valid[None, :]
    add_mask = jnp.where(allowed, 0.0, -10000.0).astype(jnp.float32)  # (B*S, B*S)

    probs_pad = fused_model(params, ids_flat, tt_flat, add_mask, B, S)  # (B*S, CLS_PAD)
    probabilities = probs_pad[:, :NUM_CLASSES].reshape(B, S, NUM_CLASSES)
    predictions = (probabilities > THRESHOLD).astype(jnp.int32)
    return probabilities, predictions


# ----------------------------- main -------------------------------------------
if __name__ == "__main__":
    key = jax.random.PRNGKey(0)
    k_ids, k_params = jax.random.split(key)

    B, S = 2, 8
    input_ids = jax.random.randint(k_ids, (B, S), 0, VOCAB, dtype=jnp.int32)
    attention_mask = jnp.array(
        [[1, 1, 1, 1, 1, 1, 1, 1],
         [1, 1, 1, 1, 1, 1, 0, 0]], dtype=jnp.int32)
    token_type_ids = jnp.zeros((B, S), dtype=jnp.int32)

    params = init_params(k_params)

    forward = jax.jit(n2c2_forward)
    probabilities, predictions = forward(params, input_ids, attention_mask,
                                         token_type_ids)
    jax.block_until_ready((probabilities, predictions))

    assert probabilities.shape == (B, S, NUM_CLASSES)
    assert predictions.shape == (B, S, NUM_CLASSES)
    assert probabilities.dtype == jnp.float32
    assert predictions.dtype == jnp.int32
    # predictions must be exactly the thresholded probabilities
    assert bool(jnp.all(predictions == (probabilities > THRESHOLD).astype(jnp.int32)))
    # probabilities must be valid sigmoid outputs
    assert bool(jnp.all((probabilities > 0.0) & (probabilities < 1.0)))

    print("KERNEL_OK")
</pallas_src>

<mosaic_0001>
module attributes {stable_mosaic.version = 11 : i64} {
  func.func @_model_kernel(%arg0: memref<16x1xi32, #tpu.memory_space<vmem>>, %arg1: memref<16x1xi32, #tpu.memory_space<vmem>>, %arg2: memref<16x16xf32, #tpu.memory_space<vmem>>, %arg3: memref<64x32xf32, #tpu.memory_space<vmem>>, %arg4: memref<16x32xf32, #tpu.memory_space<vmem>>, %arg5: memref<2x32xf32, #tpu.memory_space<vmem>>, %arg6: memref<1x32xf32, #tpu.memory_space<vmem>>, %arg7: memref<1x32xf32, #tpu.memory_space<vmem>>, %arg8: memref<2x32x96xbf16, #tpu.memory_space<vmem>>, %arg9: memref<2x1x96xf32, #tpu.memory_space<vmem>>, %arg10: memref<2x32x32xbf16, #tpu.memory_space<vmem>>, %arg11: memref<2x1x32xf32, #tpu.memory_space<vmem>>, %arg12: memref<2x1x32xf32, #tpu.memory_space<vmem>>, %arg13: memref<2x1x32xf32, #tpu.memory_space<vmem>>, %arg14: memref<2x32x64xbf16, #tpu.memory_space<vmem>>, %arg15: memref<2x1x64xf32, #tpu.memory_space<vmem>>, %arg16: memref<2x64x32xbf16, #tpu.memory_space<vmem>>, %arg17: memref<2x1x32xf32, #tpu.memory_space<vmem>>, %arg18: memref<2x1x32xf32, #tpu.memory_space<vmem>>, %arg19: memref<2x1x32xf32, #tpu.memory_space<vmem>>, %arg20: memref<32x128xbf16, #tpu.memory_space<vmem>>, %arg21: memref<1x128xf32, #tpu.memory_space<vmem>>, %arg22: memref<16x128xf32, #tpu.memory_space<vmem>>) attributes {dimension_semantics = [], scalar_prefetch = 0 : i64, scratch_operands = 0 : i64, tpu.core_type = #tpu.core_type<tc>} {
    %0 = tpu.iota {dimensions = array<i32: 1>} : vector<16x64xi32>
    %c0 = arith.constant 0 : index
    %c0_0 = arith.constant 0 : index
    %1 = vector.load %arg0[%c0, %c0_0] : memref<16x1xi32, #tpu.memory_space<vmem>>, vector<16x1xi32>
    %2 = vector.broadcast %1 : vector<16x1xi32> to vector<16x64xi32>
    %3 = arith.cmpi eq, %2, %0 : vector<16x64xi32>
    %4 = arith.extui %3 : vector<16x64xi1> to vector<16x64xi32>
    %5 = arith.sitofp %4 : vector<16x64xi32> to vector<16x64xf32>
    %c0_1 = arith.constant 0 : index
    %c0_2 = arith.constant 0 : index
    %6 = vector.load %arg3[%c0_1, %c0_2] : memref<64x32xf32, #tpu.memory_space<vmem>>, vector<64x32xf32>
    %cst = arith.constant dense<0.000000e+00> : vector<16x32xf32>
    %7 = tpu.matmul %5, %6, %cst {dimension_numbers = #tpu.dot_dimension_numbers<[1], [0], [0], [1], [0, 0, 1, 1], [], []>} : vector<16x64xf32>, vector<64x32xf32>, vector<16x32xf32> -> vector<16x32xf32>
    %c0_3 = arith.constant 0 : index
    %c0_4 = arith.constant 0 : index
    %8 = vector.load %arg4[%c0_3, %c0_4] : memref<16x32xf32, #tpu.memory_space<vmem>>, vector<8x32xf32>
    %9 = tpu.concatenate %8, %8 in 0 : vector<8x32xf32>, vector<8x32xf32> -> vector<16x32xf32>
    %10 = arith.addf %7, %9 : vector<16x32xf32>
    %c0_5 = arith.constant 0 : index
    %c0_6 = arith.constant 0 : index
    %11 = vector.load %arg1[%c0_5, %c0_6] : memref<16x1xi32, #tpu.memory_space<vmem>>, vector<16x1xi32>
    %c0_i32 = arith.constant 0 : i32
    %12 = vector.broadcast %c0_i32 : i32 to vector<16x1xi32>
    %13 = arith.cmpi eq, %11, %12 : vector<16x1xi32>
    %c0_7 = arith.constant 0 : index
    %c0_8 = arith.constant 0 : index
    %14 = vector.load %arg5[%c0_7, %c0_8] : memref<2x32xf32, #tpu.memory_space<vmem>>, vector<1x32xf32>
    %c1 = arith.constant 1 : index
    %c0_9 = arith.constant 0 : index
    %15 = vector.load %arg5[%c1, %c0_9] : memref<2x32xf32, #tpu.memory_space<vmem>>, vector<1x32xf32>
    %16 = vector.shape_cast %13 : vector<16x1xi1> to vector<16x1xi1>
    %17 = vector.broadcast %16 : vector<16x1xi1> to vector<16x32xi1>
    %18 = vector.shape_cast %14 : vector<1x32xf32> to vector<1x32xf32>
    %19 = vector.broadcast %18 : vector<1x32xf32> to vector<16x32xf32>
    %20 = vector.shape_cast %15 : vector<1x32xf32> to vector<1x32xf32>
    %21 = vector.broadcast %20 : vector<1x32xf32> to vector<16x32xf32>
    %22 = arith.select %17, %19, %21 : vector<16x32xi1>, vector<16x32xf32>
    %23 = arith.addf %10, %22 : vector<16x32xf32>
    %c0_10 = arith.constant 0 : index
    %c0_11 = arith.constant 0 : index
    %24 = vector.load %arg6[%c0_10, %c0_11] : memref<1x32xf32, #tpu.memory_space<vmem>>, vector<1x32xf32>
    %c0_12 = arith.constant 0 : index
    %c0_13 = arith.constant 0 : index
    %25 = vector.load %arg7[%c0_12, %c0_13] : memref<1x32xf32, #tpu.memory_space<vmem>>, vector<1x32xf32>
    %cst_14 = arith.constant dense<0.000000e+00> : vector<16xf32>
    %26 = vector.multi_reduction <add>, %23, %cst_14 [1] : vector<16x32xf32> to vector<16xf32>
    %27 = vector.shape_cast %26 : vector<16xf32> to vector<16x1xf32>
    %cst_15 = arith.constant 3.200000e+01 : f32
    %28 = vector.broadcast %cst_15 : f32 to vector<16x1xf32>
    %29 = arith.divf %27, %28 : vector<16x1xf32>
    %30 = vector.broadcast %29 : vector<16x1xf32> to vector<16x32xf32>
    %31 = arith.subf %23, %30 : vector<16x32xf32>
    %32 = vector.broadcast %29 : vector<16x1xf32> to vector<16x32xf32>
    %33 = arith.subf %23, %32 : vector<16x32xf32>
    %34 = arith.mulf %31, %33 : vector<16x32xf32>
    %cst_16 = arith.constant dense<0.000000e+00> : vector<16xf32>
    %35 = vector.multi_reduction <add>, %34, %cst_16 [1] : vector<16x32xf32> to vector<16xf32>
    %36 = vector.shape_cast %35 : vector<16xf32> to vector<16x1xf32>
    %cst_17 = arith.constant 3.200000e+01 : f32
    %37 = vector.broadcast %cst_17 : f32 to vector<16x1xf32>
    %38 = arith.divf %36, %37 : vector<16x1xf32>
    %39 = vector.broadcast %29 : vector<16x1xf32> to vector<16x32xf32>
    %40 = arith.subf %23, %39 : vector<16x32xf32>
    %cst_18 = arith.constant 9.99999996E-13 : f32
    %41 = vector.broadcast %cst_18 : f32 to vector<16x1xf32>
    %42 = arith.addf %38, %41 : vector<16x1xf32>
    %43 = math.rsqrt %42 : vector<16x1xf32>
    %44 = vector.broadcast %43 : vector<16x1xf32> to vector<16x32xf32>
    %45 = arith.mulf %40, %44 : vector<16x32xf32>
    %46 = vector.broadcast %24 : vector<1x32xf32> to vector<16x32xf32>
    %47 = arith.mulf %45, %46 : vector<16x32xf32>
    %48 = vector.broadcast %25 : vector<1x32xf32> to vector<16x32xf32>
    %49 = arith.addf %47, %48 : vector<16x32xf32>
    %c0_19 = arith.constant 0 : index
    %c0_20 = arith.constant 0 : index
    %50 = vector.load %arg2[%c0_19, %c0_20] : memref<16x16xf32, #tpu.memory_space<vmem>>, vector<16x16xf32>
    %c0_21 = arith.constant 0 : index
    %c0_22 = arith.constant 0 : index
    %c0_23 = arith.constant 0 : index
    %51 = vector.load %arg8[%c0_21, %c0_22, %c0_23] : memref<2x32x96xbf16, #tpu.memory_space<vmem>>, vector<1x32x96xbf16>
    %52 = vector.shape_cast %51 : vector<1x32x96xbf16> to vector<32x96xbf16>
    %53 = arith.truncf %49 : vector<16x32xf32> to vector<16x32xbf16>
    %cst_24 = arith.constant dense<0.000000e+00> : vector<16x96xf32>
    %54 = tpu.matmul %53, %52, %cst_24 {dimension_numbers = #tpu.dot_dimension_numbers<[1], [0], [0], [1], [0, 0, 1, 1], [], []>} : vector<16x32xbf16>, vector<32x96xbf16>, vector<16x96xf32> -> vector<16x96xf32>
    %c0_25 = arith.constant 0 : index
    %c0_26 = arith.constant 0 : index
    %c0_27 = arith.constant 0 : index
    %55 = vector.load %arg9[%c0_25, %c0_26, %c0_27] : memref<2x1x96xf32, #tpu.memory_space<vmem>>, vector<1x1x96xf32>
    %56 = vector.shape_cast %55 : vector<1x1x96xf32> to vector<1x96xf32>
    %57 = vector.broadcast %56 : vector<1x96xf32> to vector<16x96xf32>
    %58 = arith.addf %54, %57 : vector<16x96xf32>
    %59 = vector.extract_strided_slice %58 {offsets = [0, 0], sizes = [16, 16], strides = [1, 1]} : vector<16x96xf32> to vector<16x16xf32>
    %60 = vector.extract_strided_slice %58 {offsets = [0, 32], sizes = [16, 16], strides = [1, 1]} : vector<16x96xf32> to vector<16x16xf32>
    %61 = arith.truncf %59 : vector<16x16xf32> to vector<16x16xbf16>
    %62 = arith.truncf %60 : vector<16x16xf32> to vector<16x16xbf16>
    %cst_28 = arith.constant dense<0.000000e+00> : vector<16x16xf32>
    %63 = tpu.matmul %61, %62, %cst_28 {dimension_numbers = #tpu.dot_dimension_numbers<[1], [1], [0], [0], [0, 0, 1, 0], [], []>} : vector<16x16xbf16>, vector<16x16xbf16>, vector<16x16xf32> -> vector<16x16xf32>
    %cst_29 = arith.constant 2.500000e-01 : f32
    %64 = vector.broadcast %cst_29 : f32 to vector<16x16xf32>
    %65 = arith.mulf %63, %64 : vector<16x16xf32>
    %66 = arith.addf %65, %50 : vector<16x16xf32>
    %67 = vector.extract_strided_slice %58 {offsets = [0, 16], sizes = [16, 16], strides = [1, 1]} : vector<16x96xf32> to vector<16x16xf32>
    %68 = vector.extract_strided_slice %58 {offsets = [0, 48], sizes = [16, 16], strides = [1, 1]} : vector<16x96xf32> to vector<16x16xf32>
    %69 = arith.truncf %67 : vector<16x16xf32> to vector<16x16xbf16>
    %70 = arith.truncf %68 : vector<16x16xf32> to vector<16x16xbf16>
    %cst_30 = arith.constant dense<0.000000e+00> : vector<16x16xf32>
    %71 = tpu.matmul %69, %70, %cst_30 {dimension_numbers = #tpu.dot_dimension_numbers<[1], [1], [0], [0], [0, 0, 1, 0], [], []>} : vector<16x16xbf16>, vector<16x16xbf16>, vector<16x16xf32> -> vector<16x16xf32>
    %cst_31 = arith.constant 2.500000e-01 : f32
    %72 = vector.broadcast %cst_31 : f32 to vector<16x16xf32>
    %73 = arith.mulf %71, %72 : vector<16x16xf32>
    %74 = arith.addf %73, %50 : vector<16x16xf32>
    %75 = tpu.concatenate %66, %74 in 0 : vector<16x16xf32>, vector<16x16xf32> -> vector<32x16xf32>
    %cst_32 = arith.constant dense<0xFF800000> : vector<32xf32>
    %76 = vector.multi_reduction <maximumf>, %75, %cst_32 [1] : vector<32x16xf32> to vector<32xf32>
    %77 = vector.shape_cast %76 : vector<32xf32> to vector<32x1xf32>
    %78 = vector.broadcast %77 : vector<32x1xf32> to vector<32x16xf32>
    %79 = arith.subf %75, %78 : vector<32x16xf32>
    %80 = math.exp %79 : vector<32x16xf32>
    %cst_33 = arith.constant dense<0.000000e+00> : vector<32xf32>
    %81 = vector.multi_reduction <add>, %80, %cst_33 [1] : vector<32x16xf32> to vector<32xf32>
    %82 = vector.shape_cast %81 : vector<32xf32> to vector<32x1xf32>
    %83 = tpu.reciprocal %82 {approx = true} : vector<32x1xf32> -> vector<32x1xf32>
    %84 = vector.broadcast %83 : vector<32x1xf32> to vector<32x16xf32>
    %85 = arith.mulf %80, %84 : vector<32x16xf32>
    %86 = vector.extract_strided_slice %85 {offsets = [0, 0], sizes = [16, 16], strides = [1, 1]} : vector<32x16xf32> to vector<16x16xf32>
    %87 = vector.extract_strided_slice %58 {offsets = [0, 64], sizes = [16, 16], strides = [1, 1]} : vector<16x96xf32> to vector<16x16xf32>
    %88 = arith.truncf %86 : vector<16x16xf32> to vector<16x16xbf16>
    %89 = arith.truncf %87 : vector<16x16xf32> to vector<16x16xbf16>
    %cst_34 = arith.constant dense<0.000000e+00> : vector<16x16xf32>
    %90 = tpu.matmul %88, %89, %cst_34 {dimension_numbers = #tpu.dot_dimension_numbers<[1], [0], [0], [1], [0, 0, 1, 1], [], []>} : vector<16x16xbf16>, vector<16x16xbf16>, vector<16x16xf32> -> vector<16x16xf32>
    %91 = vector.extract_strided_slice %85 {offsets = [16, 0], sizes = [16, 16], strides = [1, 1]} : vector<32x16xf32> to vector<16x16xf32>
    %92 = vector.extract_strided_slice %58 {offsets = [0, 80], sizes = [16, 16], strides = [1, 1]} : vector<16x96xf32> to vector<16x16xf32>
    %93 = arith.truncf %91 : vector<16x16xf32> to vector<16x16xbf16>
    %94 = arith.truncf %92 : vector<16x16xf32> to vector<16x16xbf16>
    %cst_35 = arith.constant dense<0.000000e+00> : vector<16x16xf32>
    %95 = tpu.matmul %93, %94, %cst_35 {dimension_numbers = #tpu.dot_dimension_numbers<[1], [0], [0], [1], [0, 0, 1, 1], [], []>} : vector<16x16xbf16>, vector<16x16xbf16>, vector<16x16xf32> -> vector<16x16xf32>
    %96 = tpu.concatenate %90, %95 in 1 : vector<16x16xf32>, vector<16x16xf32> -> vector<16x32xf32>
    %c0_36 = arith.constant 0 : index
    %c0_37 = arith.constant 0 : index
    %c0_38 = arith.constant 0 : index
    %97 = vector.load %arg10[%c0_36, %c0_37, %c0_38] : memref<2x32x32xbf16, #tpu.memory_space<vmem>>, vector<1x32x32xbf16>
    %98 = vector.shape_cast %97 : vector<1x32x32xbf16> to vector<32x32xbf16>
    %99 = arith.truncf %96 : vector<16x32xf32> to vector<16x32xbf16>
    %cst_39 = arith.constant dense<0.000000e+00> : vector<16x32xf32>
    %100 = tpu.matmul %99, %98, %cst_39 {dimension_numbers = #tpu.dot_dimension_numbers<[1], [0], [0], [1], [0, 0, 1, 1], [], []>} : vector<16x32xbf16>, vector<32x32xbf16>, vector<16x32xf32> -> vector<16x32xf32>
    %c0_40 = arith.constant 0 : index
    %c0_41 = arith.constant 0 : index
    %c0_42 = arith.constant 0 : index
    %101 = vector.load %arg11[%c0_40, %c0_41, %c0_42] : memref<2x1x32xf32, #tpu.memory_space<vmem>>, vector<1x1x32xf32>
    %102 = vector.shape_cast %101 : vector<1x1x32xf32> to vector<1x32xf32>
    %103 = vector.broadcast %102 : vector<1x32xf32> to vector<16x32xf32>
    %104 = arith.addf %100, %103 : vector<16x32xf32>
    %105 = arith.addf %104, %49 : vector<16x32xf32>
    %c0_43 = arith.constant 0 : index
    %c0_44 = arith.constant 0 : index
    %c0_45 = arith.constant 0 : index
    %106 = vector.load %arg12[%c0_43, %c0_44, %c0_45] : memref<2x1x32xf32, #tpu.memory_space<vmem>>, vector<1x1x32xf32>
    %107 = vector.shape_cast %106 : vector<1x1x32xf32> to vector<1x32xf32>
    %c0_46 = arith.constant 0 : index
    %c0_47 = arith.constant 0 : index
    %c0_48 = arith.constant 0 : index
    %108 = vector.load %arg13[%c0_46, %c0_47, %c0_48] : memref<2x1x32xf32, #tpu.memory_space<vmem>>, vector<1x1x32xf32>
    %109 = vector.shape_cast %108 : vector<1x1x32xf32> to vector<1x32xf32>
    %cst_49 = arith.constant dense<0.000000e+00> : vector<16xf32>
    %110 = vector.multi_reduction <add>, %105, %cst_49 [1] : vector<16x32xf32> to vector<16xf32>
    %111 = vector.shape_cast %110 : vector<16xf32> to vector<16x1xf32>
    %cst_50 = arith.constant 3.200000e+01 : f32
    %112 = vector.broadcast %cst_50 : f32 to vector<16x1xf32>
    %113 = arith.divf %111, %112 : vector<16x1xf32>
    %114 = vector.broadcast %113 : vector<16x1xf32> to vector<16x32xf32>
    %115 = arith.subf %105, %114 : vector<16x32xf32>
    %116 = vector.broadcast %113 : vector<16x1xf32> to vector<16x32xf32>
    %117 = arith.subf %105, %116 : vector<16x32xf32>
    %118 = arith.mulf %115, %117 : vector<16x32xf32>
    %cst_51 = arith.constant dense<0.000000e+00> : vector<16xf32>
    %119 = vector.multi_reduction <add>, %118, %cst_51 [1] : vector<16x32xf32> to vector<16xf32>
    %120 = vector.shape_cast %119 : vector<16xf32> to vector<16x1xf32>
    %cst_52 = arith.constant 3.200000e+01 : f32
    %121 = vector.broadcast %cst_52 : f32 to vector<16x1xf32>
    %122 = arith.divf %120, %121 : vector<16x1xf32>
    %123 = vector.broadcast %113 : vector<16x1xf32> to vector<16x32xf32>
    %124 = arith.subf %105, %123 : vector<16x32xf32>
    %cst_53 = arith.constant 9.99999996E-13 : f32
    %125 = vector.broadcast %cst_53 : f32 to vector<16x1xf32>
    %126 = arith.addf %122, %125 : vector<16x1xf32>
    %127 = math.rsqrt %126 : vector<16x1xf32>
    %128 = vector.broadcast %127 : vector<16x1xf32> to vector<16x32xf32>
    %129 = arith.mulf %124, %128 : vector<16x32xf32>
    %130 = vector.broadcast %107 : vector<1x32xf32> to vector<16x32xf32>
    %131 = arith.mulf %129, %130 : vector<16x32xf32>
    %132 = vector.broadcast %109 : vector<1x32xf32> to vector<16x32xf32>
    %133 = arith.addf %131, %132 : vector<16x32xf32>
    %c0_54 = arith.constant 0 : index
    %c0_55 = arith.constant 0 : index
    %c0_56 = arith.constant 0 : index
    %134 = vector.load %arg14[%c0_54, %c0_55, %c0_56] : memref<2x32x64xbf16, #tpu.memory_space<vmem>>, vector<1x32x64xbf16>
    %135 = vector.shape_cast %134 : vector<1x32x64xbf16> to vector<32x64xbf16>
    %136 = arith.truncf %133 : vector<16x32xf32> to vector<16x32xbf16>
    %cst_57 = arith.constant dense<0.000000e+00> : vector<16x64xf32>
    %137 = tpu.matmul %136, %135, %cst_57 {dimension_numbers = #tpu.dot_dimension_numbers<[1], [0], [0], [1], [0, 0, 1, 1], [], []>} : vector<16x32xbf16>, vector<32x64xbf16>, vector<16x64xf32> -> vector<16x64xf32>
    %c0_58 = arith.constant 0 : index
    %c0_59 = arith.constant 0 : index
    %c0_60 = arith.constant 0 : index
    %138 = vector.load %arg15[%c0_58, %c0_59, %c0_60] : memref<2x1x64xf32, #tpu.memory_space<vmem>>, vector<1x1x64xf32>
    %139 = vector.shape_cast %138 : vector<1x1x64xf32> to vector<1x64xf32>
    %140 = vector.broadcast %139 : vector<1x64xf32> to vector<16x64xf32>
    %141 = arith.addf %137, %140 : vector<16x64xf32>
    %cst_61 = arith.constant 5.000000e-01 : f32
    %142 = vector.broadcast %cst_61 : f32 to vector<16x64xf32>
    %143 = arith.mulf %142, %141 : vector<16x64xf32>
    %cst_62 = arith.constant 4.471500e-02 : f32
    %144 = vector.broadcast %cst_62 : f32 to vector<16x64xf32>
    %145 = arith.mulf %144, %141 : vector<16x64xf32>
    %146 = arith.mulf %145, %141 : vector<16x64xf32>
    %147 = arith.mulf %146, %141 : vector<16x64xf32>
    %148 = arith.addf %141, %147 : vector<16x64xf32>
    %cst_63 = arith.constant 0.797884583 : f32
    %149 = vector.broadcast %cst_63 : f32 to vector<16x64xf32>
    %150 = arith.mulf %149, %148 : vector<16x64xf32>
    %151 = math.tanh %150 : vector<16x64xf32>
    %cst_64 = arith.constant 1.000000e+00 : f32
    %152 = vector.broadcast %cst_64 : f32 to vector<16x64xf32>
    %153 = arith.addf %152, %151 : vector<16x64xf32>
    %154 = arith.mulf %143, %153 : vector<16x64xf32>
    %c0_65 = arith.constant 0 : index
    %c0_66 = arith.constant 0 : index
    %c0_67 = arith.constant 0 : index
    %155 = vector.load %arg16[%c0_65, %c0_66, %c0_67] : memref<2x64x32xbf16, #tpu.memory_space<vmem>>, vector<1x64x32xbf16>
    %156 = vector.shape_cast %155 : vector<1x64x32xbf16> to vector<64x32xbf16>
    %157 = arith.truncf %154 : vector<16x64xf32> to vector<16x64xbf16>
    %cst_68 = arith.constant dense<0.000000e+00> : vector<16x32xf32>
    %158 = tpu.matmul %157, %156, %cst_68 {dimension_numbers = #tpu.dot_dimension_numbers<[1], [0], [0], [1], [0, 0, 1, 1], [], []>} : vector<16x64xbf16>, vector<64x32xbf16>, vector<16x32xf32> -> vector<16x32xf32>
    %c0_69 = arith.constant 0 : index
    %c0_70 = arith.constant 0 : index
    %c0_71 = arith.constant 0 : index
    %159 = vector.load %arg17[%c0_69, %c0_70, %c0_71] : memref<2x1x32xf32, #tpu.memory_space<vmem>>, vector<1x1x32xf32>
    %160 = vector.shape_cast %159 : vector<1x1x32xf32> to vector<1x32xf32>
    %161 = vector.broadcast %160 : vector<1x32xf32> to vector<16x32xf32>
    %162 = arith.addf %158, %161 : vector<16x32xf32>
    %163 = arith.addf %162, %133 : vector<16x32xf32>
    %c0_72 = arith.constant 0 : index
    %c0_73 = arith.constant 0 : index
    %c0_74 = arith.constant 0 : index
    %164 = vector.load %arg18[%c0_72, %c0_73, %c0_74] : memref<2x1x32xf32, #tpu.memory_space<vmem>>, vector<1x1x32xf32>
    %165 = vector.shape_cast %164 : vector<1x1x32xf32> to vector<1x32xf32>
    %c0_75 = arith.constant 0 : index
    %c0_76 = arith.constant 0 : index
    %c0_77 = arith.constant 0 : index
    %166 = vector.load %arg19[%c0_75, %c0_76, %c0_77] : memref<2x1x32xf32, #tpu.memory_space<vmem>>, vector<1x1x32xf32>
    %167 = vector.shape_cast %166 : vector<1x1x32xf32> to vector<1x32xf32>
    %cst_78 = arith.constant dense<0.000000e+00> : vector<16xf32>
    %168 = vector.multi_reduction <add>, %163, %cst_78 [1] : vector<16x32xf32> to vector<16xf32>
    %169 = vector.shape_cast %168 : vector<16xf32> to vector<16x1xf32>
    %cst_79 = arith.constant 3.200000e+01 : f32
    %170 = vector.broadcast %cst_79 : f32 to vector<16x1xf32>
    %171 = arith.divf %169, %170 : vector<16x1xf32>
    %172 = vector.broadcast %171 : vector<16x1xf32> to vector<16x32xf32>
    %173 = arith.subf %163, %172 : vector<16x32xf32>
    %174 = vector.broadcast %171 : vector<16x1xf32> to vector<16x32xf32>
    %175 = arith.subf %163, %174 : vector<16x32xf32>
    %176 = arith.mulf %173, %175 : vector<16x32xf32>
    %cst_80 = arith.constant dense<0.000000e+00> : vector<16xf32>
    %177 = vector.multi_reduction <add>, %176, %cst_80 [1] : vector<16x32xf32> to vector<16xf32>
    %178 = vector.shape_cast %177 : vector<16xf32> to vector<16x1xf32>
    %cst_81 = arith.constant 3.200000e+01 : f32
    %179 = vector.broadcast %cst_81 : f32 to vector<16x1xf32>
    %180 = arith.divf %178, %179 : vector<16x1xf32>
    %181 = vector.broadcast %171 : vector<16x1xf32> to vector<16x32xf32>
    %182 = arith.subf %163, %181 : vector<16x32xf32>
    %cst_82 = arith.constant 9.99999996E-13 : f32
    %183 = vector.broadcast %cst_82 : f32 to vector<16x1xf32>
    %184 = arith.addf %180, %183 : vector<16x1xf32>
    %185 = math.rsqrt %184 : vector<16x1xf32>
    %186 = vector.broadcast %185 : vector<16x1xf32> to vector<16x32xf32>
    %187 = arith.mulf %182, %186 : vector<16x32xf32>
    %188 = vector.broadcast %165 : vector<1x32xf32> to vector<16x32xf32>
    %189 = arith.mulf %187, %188 : vector<16x32xf32>
    %190 = vector.broadcast %167 : vector<1x32xf32> to vector<16x32xf32>
    %191 = arith.addf %189, %190 : vector<16x32xf32>
    %c1_83 = arith.constant 1 : index
    %c0_84 = arith.constant 0 : index
    %c0_85 = arith.constant 0 : index
    %192 = vector.load %arg8[%c1_83, %c0_84, %c0_85] : memref<2x32x96xbf16, #tpu.memory_space<vmem>>, vector<1x32x96xbf16>
    %193 = vector.shape_cast %192 : vector<1x32x96xbf16> to vector<32x96xbf16>
    %194 = arith.truncf %191 : vector<16x32xf32> to vector<16x32xbf16>
    %cst_86 = arith.constant dense<0.000000e+00> : vector<16x96xf32>
    %195 = tpu.matmul %194, %193, %cst_86 {dimension_numbers = #tpu.dot_dimension_numbers<[1], [0], [0], [1], [0, 0, 1, 1], [], []>} : vector<16x32xbf16>, vector<32x96xbf16>, vector<16x96xf32> -> vector<16x96xf32>
    %c1_87 = arith.constant 1 : index
    %c0_88 = arith.constant 0 : index
    %c0_89 = arith.constant 0 : index
    %196 = vector.load %arg9[%c1_87, %c0_88, %c0_89] : memref<2x1x96xf32, #tpu.memory_space<vmem>>, vector<1x1x96xf32>
    %197 = vector.shape_cast %196 : vector<1x1x96xf32> to vector<1x96xf32>
    %198 = vector.broadcast %197 : vector<1x96xf32> to vector<16x96xf32>
    %199 = arith.addf %195, %198 : vector<16x96xf32>
    %200 = vector.extract_strided_slice %199 {offsets = [0, 0], sizes = [16, 16], strides = [1, 1]} : vector<16x96xf32> to vector<16x16xf32>
    %201 = vector.extract_strided_slice %199 {offsets = [0, 32], sizes = [16, 16], strides = [1, 1]} : vector<16x96xf32> to vector<16x16xf32>
    %202 = arith.truncf %200 : vector<16x16xf32> to vector<16x16xbf16>
    %203 = arith.truncf %201 : vector<16x16xf32> to vector<16x16xbf16>
    %cst_90 = arith.constant dense<0.000000e+00> : vector<16x16xf32>
    %204 = tpu.matmul %202, %203, %cst_90 {dimension_numbers = #tpu.dot_dimension_numbers<[1], [1], [0], [0], [0, 0, 1, 0], [], []>} : vector<16x16xbf16>, vector<16x16xbf16>, vector<16x16xf32> -> vector<16x16xf32>
    %cst_91 = arith.constant 2.500000e-01 : f32
    %205 = vector.broadcast %cst_91 : f32 to vector<16x16xf32>
    %206 = arith.mulf %204, %205 : vector<16x16xf32>
    %207 = arith.addf %206, %50 : vector<16x16xf32>
    %208 = vector.extract_strided_slice %199 {offsets = [0, 16], sizes = [16, 16], strides = [1, 1]} : vector<16x96xf32> to vector<16x16xf32>
    %209 = vector.extract_strided_slice %199 {offsets = [0, 48], sizes = [16, 16], strides = [1, 1]} : vector<16x96xf32> to vector<16x16xf32>
    %210 = arith.truncf %208 : vector<16x16xf32> to vector<16x16xbf16>
    %211 = arith.truncf %209 : vector<16x16xf32> to vector<16x16xbf16>
    %cst_92 = arith.constant dense<0.000000e+00> : vector<16x16xf32>
    %212 = tpu.matmul %210, %211, %cst_92 {dimension_numbers = #tpu.dot_dimension_numbers<[1], [1], [0], [0], [0, 0, 1, 0], [], []>} : vector<16x16xbf16>, vector<16x16xbf16>, vector<16x16xf32> -> vector<16x16xf32>
    %cst_93 = arith.constant 2.500000e-01 : f32
    %213 = vector.broadcast %cst_93 : f32 to vector<16x16xf32>
    %214 = arith.mulf %212, %213 : vector<16x16xf32>
    %215 = arith.addf %214, %50 : vector<16x16xf32>
    %216 = tpu.concatenate %207, %215 in 0 : vector<16x16xf32>, vector<16x16xf32> -> vector<32x16xf32>
    %cst_94 = arith.constant dense<0xFF800000> : vector<32xf32>
    %217 = vector.multi_reduction <maximumf>, %216, %cst_94 [1] : vector<32x16xf32> to vector<32xf32>
    %218 = vector.shape_cast %217 : vector<32xf32> to vector<32x1xf32>
    %219 = vector.broadcast %218 : vector<32x1xf32> to vector<32x16xf32>
    %220 = arith.subf %216, %219 : vector<32x16xf32>
    %221 = math.exp %220 : vector<32x16xf32>
    %cst_95 = arith.constant dense<0.000000e+00> : vector<32xf32>
    %222 = vector.multi_reduction <add>, %221, %cst_95 [1] : vector<32x16xf32> to vector<32xf32>
    %223 = vector.shape_cast %222 : vector<32xf32> to vector<32x1xf32>
    %224 = tpu.reciprocal %223 {approx = true} : vector<32x1xf32> -> vector<32x1xf32>
    %225 = vector.broadcast %224 : vector<32x1xf32> to vector<32x16xf32>
    %226 = arith.mulf %221, %225 : vector<32x16xf32>
    %227 = vector.extract_strided_slice %226 {offsets = [0, 0], sizes = [16, 16], strides = [1, 1]} : vector<32x16xf32> to vector<16x16xf32>
    %228 = vector.extract_strided_slice %199 {offsets = [0, 64], sizes = [16, 16], strides = [1, 1]} : vector<16x96xf32> to vector<16x16xf32>
    %229 = arith.truncf %227 : vector<16x16xf32> to vector<16x16xbf16>
    %230 = arith.truncf %228 : vector<16x16xf32> to vector<16x16xbf16>
    %cst_96 = arith.constant dense<0.000000e+00> : vector<16x16xf32>
    %231 = tpu.matmul %229, %230, %cst_96 {dimension_numbers = #tpu.dot_dimension_numbers<[1], [0], [0], [1], [0, 0, 1, 1], [], []>} : vector<16x16xbf16>, vector<16x16xbf16>, vector<16x16xf32> -> vector<16x16xf32>
    %232 = vector.extract_strided_slice %226 {offsets = [16, 0], sizes = [16, 16], strides = [1, 1]} : vector<32x16xf32> to vector<16x16xf32>
    %233 = vector.extract_strided_slice %199 {offsets = [0, 80], sizes = [16, 16], strides = [1, 1]} : vector<16x96xf32> to vector<16x16xf32>
    %234 = arith.truncf %232 : vector<16x16xf32> to vector<16x16xbf16>
    %235 = arith.truncf %233 : vector<16x16xf32> to vector<16x16xbf16>
    %cst_97 = arith.constant dense<0.000000e+00> : vector<16x16xf32>
    %236 = tpu.matmul %234, %235, %cst_97 {dimension_numbers = #tpu.dot_dimension_numbers<[1], [0], [0], [1], [0, 0, 1, 1], [], []>} : vector<16x16xbf16>, vector<16x16xbf16>, vector<16x16xf32> -> vector<16x16xf32>
    %237 = tpu.concatenate %231, %236 in 1 : vector<16x16xf32>, vector<16x16xf32> -> vector<16x32xf32>
    %c1_98 = arith.constant 1 : index
    %c0_99 = arith.constant 0 : index
    %c0_100 = arith.constant 0 : index
    %238 = vector.load %arg10[%c1_98, %c0_99, %c0_100] : memref<2x32x32xbf16, #tpu.memory_space<vmem>>, vector<1x32x32xbf16>
    %239 = vector.shape_cast %238 : vector<1x32x32xbf16> to vector<32x32xbf16>
    %240 = arith.truncf %237 : vector<16x32xf32> to vector<16x32xbf16>
    %cst_101 = arith.constant dense<0.000000e+00> : vector<16x32xf32>
    %241 = tpu.matmul %240, %239, %cst_101 {dimension_numbers = #tpu.dot_dimension_numbers<[1], [0], [0], [1], [0, 0, 1, 1], [], []>} : vector<16x32xbf16>, vector<32x32xbf16>, vector<16x32xf32> -> vector<16x32xf32>
    %c1_102 = arith.constant 1 : index
    %c0_103 = arith.constant 0 : index
    %c0_104 = arith.constant 0 : index
    %242 = vector.load %arg11[%c1_102, %c0_103, %c0_104] : memref<2x1x32xf32, #tpu.memory_space<vmem>>, vector<1x1x32xf32>
    %243 = vector.shape_cast %242 : vector<1x1x32xf32> to vector<1x32xf32>
    %244 = vector.broadcast %243 : vector<1x32xf32> to vector<16x32xf32>
    %245 = arith.addf %241, %244 : vector<16x32xf32>
    %246 = arith.addf %245, %191 : vector<16x32xf32>
    %c1_105 = arith.constant 1 : index
    %c0_106 = arith.constant 0 : index
    %c0_107 = arith.constant 0 : index
    %247 = vector.load %arg12[%c1_105, %c0_106, %c0_107] : memref<2x1x32xf32, #tpu.memory_space<vmem>>, vector<1x1x32xf32>
    %248 = vector.shape_cast %247 : vector<1x1x32xf32> to vector<1x32xf32>
    %c1_108 = arith.constant 1 : index
    %c0_109 = arith.constant 0 : index
    %c0_110 = arith.constant 0 : index
    %249 = vector.load %arg13[%c1_108, %c0_109, %c0_110] : memref<2x1x32xf32, #tpu.memory_space<vmem>>, vector<1x1x32xf32>
    %250 = vector.shape_cast %249 : vector<1x1x32xf32> to vector<1x32xf32>
    %cst_111 = arith.constant dense<0.000000e+00> : vector<16xf32>
    %251 = vector.multi_reduction <add>, %246, %cst_111 [1] : vector<16x32xf32> to vector<16xf32>
    %252 = vector.shape_cast %251 : vector<16xf32> to vector<16x1xf32>
    %cst_112 = arith.constant 3.200000e+01 : f32
    %253 = vector.broadcast %cst_112 : f32 to vector<16x1xf32>
    %254 = arith.divf %252, %253 : vector<16x1xf32>
    %255 = vector.broadcast %254 : vector<16x1xf32> to vector<16x32xf32>
    %256 = arith.subf %246, %255 : vector<16x32xf32>
    %257 = vector.broadcast %254 : vector<16x1xf32> to vector<16x32xf32>
    %258 = arith.subf %246, %257 : vector<16x32xf32>
    %259 = arith.mulf %256, %258 : vector<16x32xf32>
    %cst_113 = arith.constant dense<0.000000e+00> : vector<16xf32>
    %260 = vector.multi_reduction <add>, %259, %cst_113 [1] : vector<16x32xf32> to vector<16xf32>
    %261 = vector.shape_cast %260 : vector<16xf32> to vector<16x1xf32>
    %cst_114 = arith.constant 3.200000e+01 : f32
    %262 = vector.broadcast %cst_114 : f32 to vector<16x1xf32>
    %263 = arith.divf %261, %262 : vector<16x1xf32>
    %264 = vector.broadcast %254 : vector<16x1xf32> to vector<16x32xf32>
    %265 = arith.subf %246, %264 : vector<16x32xf32>
    %cst_115 = arith.constant 9.99999996E-13 : f32
    %266 = vector.broadcast %cst_115 : f32 to vector<16x1xf32>
    %267 = arith.addf %263, %266 : vector<16x1xf32>
    %268 = math.rsqrt %267 : vector<16x1xf32>
    %269 = vector.broadcast %268 : vector<16x1xf32> to vector<16x32xf32>
    %270 = arith.mulf %265, %269 : vector<16x32xf32>
    %271 = vector.broadcast %248 : vector<1x32xf32> to vector<16x32xf32>
    %272 = arith.mulf %270, %271 : vector<16x32xf32>
    %273 = vector.broadcast %250 : vector<1x32xf32> to vector<16x32xf32>
    %274 = arith.addf %272, %273 : vector<16x32xf32>
    %c1_116 = arith.constant 1 : index
    %c0_117 = arith.constant 0 : index
    %c0_118 = arith.constant 0 : index
    %275 = vector.load %arg14[%c1_116, %c0_117, %c0_118] : memref<2x32x64xbf16, #tpu.memory_space<vmem>>, vector<1x32x64xbf16>
    %276 = vector.shape_cast %275 : vector<1x32x64xbf16> to vector<32x64xbf16>
    %277 = arith.truncf %274 : vector<16x32xf32> to vector<16x32xbf16>
    %cst_119 = arith.constant dense<0.000000e+00> : vector<16x64xf32>
    %278 = tpu.matmul %277, %276, %cst_119 {dimension_numbers = #tpu.dot_dimension_numbers<[1], [0], [0], [1], [0, 0, 1, 1], [], []>} : vector<16x32xbf16>, vector<32x64xbf16>, vector<16x64xf32> -> vector<16x64xf32>
    %c1_120 = arith.constant 1 : index
    %c0_121 = arith.constant 0 : index
    %c0_122 = arith.constant 0 : index
    %279 = vector.load %arg15[%c1_120, %c0_121, %c0_122] : memref<2x1x64xf32, #tpu.memory_space<vmem>>, vector<1x1x64xf32>
    %280 = vector.shape_cast %279 : vector<1x1x64xf32> to vector<1x64xf32>
    %281 = vector.broadcast %280 : vector<1x64xf32> to vector<16x64xf32>
    %282 = arith.addf %278, %281 : vector<16x64xf32>
    %cst_123 = arith.constant 5.000000e-01 : f32
    %283 = vector.broadcast %cst_123 : f32 to vector<16x64xf32>
    %284 = arith.mulf %283, %282 : vector<16x64xf32>
    %cst_124 = arith.constant 4.471500e-02 : f32
    %285 = vector.broadcast %cst_124 : f32 to vector<16x64xf32>
    %286 = arith.mulf %285, %282 : vector<16x64xf32>
    %287 = arith.mulf %286, %282 : vector<16x64xf32>
    %288 = arith.mulf %287, %282 : vector<16x64xf32>
    %289 = arith.addf %282, %288 : vector<16x64xf32>
    %cst_125 = arith.constant 0.797884583 : f32
    %290 = vector.broadcast %cst_125 : f32 to vector<16x64xf32>
    %291 = arith.mulf %290, %289 : vector<16x64xf32>
    %292 = math.tanh %291 : vector<16x64xf32>
    %cst_126 = arith.constant 1.000000e+00 : f32
    %293 = vector.broadcast %cst_126 : f32 to vector<16x64xf32>
    %294 = arith.addf %293, %292 : vector<16x64xf32>
    %295 = arith.mulf %284, %294 : vector<16x64xf32>
    %c1_127 = arith.constant 1 : index
    %c0_128 = arith.constant 0 : index
    %c0_129 = arith.constant 0 : index
    %296 = vector.load %arg16[%c1_127, %c0_128, %c0_129] : memref<2x64x32xbf16, #tpu.memory_space<vmem>>, vector<1x64x32xbf16>
    %297 = vector.shape_cast %296 : vector<1x64x32xbf16> to vector<64x32xbf16>
    %298 = arith.truncf %295 : vector<16x64xf32> to vector<16x64xbf16>
    %cst_130 = arith.constant dense<0.000000e+00> : vector<16x32xf32>
    %299 = tpu.matmul %298, %297, %cst_130 {dimension_numbers = #tpu.dot_dimension_numbers<[1], [0], [0], [1], [0, 0, 1, 1], [], []>} : vector<16x64xbf16>, vector<64x32xbf16>, vector<16x32xf32> -> vector<16x32xf32>
    %c1_131 = arith.constant 1 : index
    %c0_132 = arith.constant 0 : index
    %c0_133 = arith.constant 0 : index
    %300 = vector.load %arg17[%c1_131, %c0_132, %c0_133] : memref<2x1x32xf32, #tpu.memory_space<vmem>>, vector<1x1x32xf32>
    %301 = vector.shape_cast %300 : vector<1x1x32xf32> to vector<1x32xf32>
    %302 = vector.broadcast %301 : vector<1x32xf32> to vector<16x32xf32>
    %303 = arith.addf %299, %302 : vector<16x32xf32>
    %304 = arith.addf %303, %274 : vector<16x32xf32>
    %c1_134 = arith.constant 1 : index
    %c0_135 = arith.constant 0 : index
    %c0_136 = arith.constant 0 : index
    %305 = vector.load %arg18[%c1_134, %c0_135, %c0_136] : memref<2x1x32xf32, #tpu.memory_space<vmem>>, vector<1x1x32xf32>
    %306 = vector.shape_cast %305 : vector<1x1x32xf32> to vector<1x32xf32>
    %c1_137 = arith.constant 1 : index
    %c0_138 = arith.constant 0 : index
    %c0_139 = arith.constant 0 : index
    %307 = vector.load %arg19[%c1_137, %c0_138, %c0_139] : memref<2x1x32xf32, #tpu.memory_space<vmem>>, vector<1x1x32xf32>
    %308 = vector.shape_cast %307 : vector<1x1x32xf32> to vector<1x32xf32>
    %cst_140 = arith.constant dense<0.000000e+00> : vector<16xf32>
    %309 = vector.multi_reduction <add>, %304, %cst_140 [1] : vector<16x32xf32> to vector<16xf32>
    %310 = vector.shape_cast %309 : vector<16xf32> to vector<16x1xf32>
    %cst_141 = arith.constant 3.200000e+01 : f32
    %311 = vector.broadcast %cst_141 : f32 to vector<16x1xf32>
    %312 = arith.divf %310, %311 : vector<16x1xf32>
    %313 = vector.broadcast %312 : vector<16x1xf32> to vector<16x32xf32>
    %314 = arith.subf %304, %313 : vector<16x32xf32>
    %315 = vector.broadcast %312 : vector<16x1xf32> to vector<16x32xf32>
    %316 = arith.subf %304, %315 : vector<16x32xf32>
    %317 = arith.mulf %314, %316 : vector<16x32xf32>
    %cst_142 = arith.constant dense<0.000000e+00> : vector<16xf32>
    %318 = vector.multi_reduction <add>, %317, %cst_142 [1] : vector<16x32xf32> to vector<16xf32>
    %319 = vector.shape_cast %318 : vector<16xf32> to vector<16x1xf32>
    %cst_143 = arith.constant 3.200000e+01 : f32
    %320 = vector.broadcast %cst_143 : f32 to vector<16x1xf32>
    %321 = arith.divf %319, %320 : vector<16x1xf32>
    %322 = vector.broadcast %312 : vector<16x1xf32> to vector<16x32xf32>
    %323 = arith.subf %304, %322 : vector<16x32xf32>
    %cst_144 = arith.constant 9.99999996E-13 : f32
    %324 = vector.broadcast %cst_144 : f32 to vector<16x1xf32>
    %325 = arith.addf %321, %324 : vector<16x1xf32>
    %326 = math.rsqrt %325 : vector<16x1xf32>
    %327 = vector.broadcast %326 : vector<16x1xf32> to vector<16x32xf32>
    %328 = arith.mulf %323, %327 : vector<16x32xf32>
    %329 = vector.broadcast %306 : vector<1x32xf32> to vector<16x32xf32>
    %330 = arith.mulf %328, %329 : vector<16x32xf32>
    %331 = vector.broadcast %308 : vector<1x32xf32> to vector<16x32xf32>
    %332 = arith.addf %330, %331 : vector<16x32xf32>
    %c0_145 = arith.constant 0 : index
    %c0_146 = arith.constant 0 : index
    %333 = vector.load %arg20[%c0_145, %c0_146] : memref<32x128xbf16, #tpu.memory_space<vmem>>, vector<32x128xbf16>
    %334 = arith.truncf %332 : vector<16x32xf32> to vector<16x32xbf16>
    %cst_147 = arith.constant dense<0.000000e+00> : vector<16x128xf32>
    %335 = tpu.matmul %334, %333, %cst_147 {dimension_numbers = #tpu.dot_dimension_numbers<[1], [0], [0], [1], [0, 0, 1, 1], [], []>} : vector<16x32xbf16>, vector<32x128xbf16>, vector<16x128xf32> -> vector<16x128xf32>
    %c0_148 = arith.constant 0 : index
    %c0_149 = arith.constant 0 : index
    %336 = vector.load %arg21[%c0_148, %c0_149] : memref<1x128xf32, #tpu.memory_space<vmem>>, vector<1x128xf32>
    %337 = vector.broadcast %336 : vector<1x128xf32> to vector<16x128xf32>
    %338 = arith.addf %335, %337 : vector<16x128xf32>
    %339 = arith.negf %338 : vector<16x128xf32>
    %340 = math.exp %339 : vector<16x128xf32>
    %cst_150 = arith.constant 1.000000e+00 : f32
    %341 = vector.broadcast %cst_150 : f32 to vector<16x128xf32>
    %342 = arith.addf %341, %340 : vector<16x128xf32>
    %343 = arith.divf %341, %342 : vector<16x128xf32>
    %c0_151 = arith.constant 0 : index
    %c0_152 = arith.constant 0 : index
    %344 = vector.load %arg22[%c0_151, %c0_152] : memref<16x128xf32, #tpu.memory_space<vmem>>, vector<16x128xf32>
    tpu.vector_store %arg22[%c0_151, %c0_152], %343 {strides = array<i32>} : memref<16x128xf32, #tpu.memory_space<vmem>>, vector<16x128xf32>,
    return
  }
}

</mosaic_0001>

<bundles_post_ra>
// kernel: eq.8
= control target key start
LH: loop header
LB: loop body
LE: loop exit
PB: predicated region body
PF: predicated region fallthrough
CT: control target
= control target key end

     0   :  { %vm7_vm0 = vcmask 64512   ;;  %vm13_vm1 = vcmask 130112   ;;  %s39_s0 = inlined_call_operand.vmem [shape: s32[2,8], index: 0, kind: input, shape index: {}]   ;;  %s40_s1 = inlined_call_operand.vmem [shape: s32[16], index: 1, kind: output, shape index: {}]  }
   0x1   :  { %v4_v0 = vld [vmem:[%s39_s0] sm:$0x3]  ;;  %s22_s0 = smov 8  }
   0x2   :  { %5 = vst [vmem:[#allocation1] sm:$0x3] %v4_v0 }
   0x9   :  { %v10_v1 = vld [vmem:[#allocation1 + $0x1] sm:$0x1]   ;;  %v6_v2 = vld [vmem:[#allocation1] sm:$0x1]  }
   0xa   :  { %11 = vrot.lane.b32.xlu0 %v10_v1, %s22_s0  ;;  %8 = vst.msk [vmem:[#allocation0] sm:$0x1] %vm7_vm0, %v6_v2  }
  0x7c   :  { %v12_v3 = vpop.permute.xlu0 %11  }
  0x7d   :  { %14 = vst.msk [vmem:[#allocation0] sm:$0x1] %vm13_vm1, %v12_v3  }
  0x84   :  { %v18_v4 = vld [vmem:[#allocation0] sm:$0x1] }
  0x85   :  { %20 = vst [vmem:[%s40_s1] sm:$0x1] %v18_v4 }

// kernel: n2c2_forward.1
= control target key start
LH: loop header
LB: loop body
LE: loop exit
PB: predicated region body
PF: predicated region fallthrough
CT: control target
= control target key end

     0   :  { %v2095_v0 = vmov 0   ;;  %v2096_v9 = vmov 0.0   ;;  %v72_v20 = vlaneseq  ;;  %vm97_vm2 = vcmask 523264   ;;  %s2099_s30 = smov 80   ;;  %s2584_s0 = inlined_call_operand.vmem [shape: s32[16,1], index: 0, kind: input, shape index: {}]   ;;  %s2585_s3 = inlined_call_operand.vmem [shape: f32[64,32], index: 3, kind: input, shape index: {}]   ;;  %s2586_s1 = inlined_call_operand.vmem [shape: s32[16,1], index: 1, kind: input, shape index: {}]   ;;  %s2587_s5 = inlined_call_operand.vmem [shape: f32[2,32], index: 5, kind: input, shape index: {}]   ;;  %s2588_s4 = inlined_call_operand.vmem [shape: f32[16,32], index: 4, kind: input, shape index: {}]   ;;  %s2589_s8 = inlined_call_operand.vmem [shape: bf16[2,32,96], index: 8, kind: input, shape index: {}]   ;;  %s2590_s6 = inlined_call_operand.vmem [shape: f32[1,32], index: 6, kind: input, shape index: {}]   ;;  %s2591_s7 = inlined_call_operand.vmem [shape: f32[1,32], index: 7, kind: input, shape index: {}]   ;;  %s2592_s9 = inlined_call_operand.vmem [shape: f32[2,1,96], index: 9, kind: input, shape index: {}]   ;;  %s2593_s2 = inlined_call_operand.vmem [shape: f32[16,16], index: 2, kind: input, shape index: {}]   ;;  %s2594_s10 = inlined_call_operand.vmem [shape: bf16[2,32,32], index: 10, kind: input, shape index: {}]   ;;  %s2595_s11 = inlined_call_operand.vmem [shape: f32[2,1,32], index: 11, kind: input, shape index: {}]   ;;  %s2596_s14 = inlined_call_operand.vmem [shape: bf16[2,32,64], index: 14, kind: input, shape index: {}]   ;;  %s2597_s12 = inlined_call_operand.vmem [shape: f32[2,1,32], index: 12, kind: input, shape index: {}]   ;;  %s2598_s13 = inlined_call_operand.vmem [shape: f32[2,1,32], index: 13, kind: input, shape index: {}]   ;;  %s2599_s16 = inlined_call_operand.vmem [shape: bf16[2,64,32], index: 16, kind: input, shape index: {}]   ;;  %s2600_s15 = inlined_call_operand.vmem [shape: f32[2,1,64], index: 15, kind: input, shape index: {}]   ;;  %s2601_s17 = inlined_call_operand.vmem [shape: f32[2,1,32], index: 17, kind: input, shape index: {}]   ;;  %s2602_s18 = inlined_call_operand.vmem [shape: f32[2,1,32], index: 18, kind: input, shape index: {}]   ;;  %s2603_s19 = inlined_call_operand.vmem [shape: f32[2,1,32], index: 19, kind: input, shape index: {}]   ;;  %s2604_s20 = inlined_call_operand.vmem [shape: bf16[32,128], index: 20, kind: input, shape index: {}]   ;;  %s2605_s21 = inlined_call_operand.vmem [shape: f32[1,128], index: 21, kind: input, shape index: {}]   ;;  %s2606_s22 = inlined_call_operand.vmem [shape: f32[16,128], index: 22, kind: output, shape index: {}]  }
   0x1   :  { %2612 = sst [smem:[#allocation2_spill]] %s2584_s0  ;;  %1993 = vset.pattern.permute.xlu0 %v2095_v0  ;;  %1994 = vset.pattern.permute.xlu1 %v2095_v0  ;;  %vm209_vm7 = vcmask 261120   ;;  %vm2097_vm8 = vmmov 0   ;;  %vm327_vm9 = vcmask 130048  }
   0x2   :  { %2613 = sst [smem:[#allocation3_spill]] %s2585_s3  ;;  %s2619_s29 = sld [smem:[#allocation2_spill]]  ;;  %1840 = vmatprep.subr.bf16.mxu1 %v2096_v9  ;;  %v73_v21 = vand.u32 127, %v72_v20  ;;  %1844 = vmatprep.mubr.msk.bf16.mxu1 %vm2097_vm8, %v2096_v9 }
   0x3   :  { %2614 = sst [smem:[#allocation4_spill]] %s2586_s1  ;;  %s2620_s0 = sld [smem:[#allocation3_spill]] }
   0x4   :  { %2615 = sst [smem:[#allocation5_spill]] %s2587_s5 }
   0x5   :  { %2616 = sst [smem:[#allocation6_spill]] %s2588_s4  ;;  %s2622_s27 = sld [smem:[#allocation5_spill]] }
   0x6   :  { %2617 = sst [smem:[#allocation7_spill]] %s2589_s8  ;;  %s2100_s4 = smov 96  }
   0x7   :  { %2618 = sst [smem:[#allocation8_spill]] %s2590_s6  ;;  %s2621_s6 = sld [smem:[#allocation4_spill]] }
   0x8   :  { %v74_v1 = vld [vmem:[%s2619_s29] sm:$0xff]  ;;  %v75_v6 = vld [vmem:[%s2619_s29 + $0x8] sm:$0xff]  ;;  %s2623_s29 = sld [smem:[#allocation6_spill]]  ;;  %s2624_s8 = sld [smem:[#allocation7_spill]] }
   0x9   :  { %v88_v2 = vld [vmem:[%s2620_s0] sm:$0xff]  ;;  %77 = vperm.xlu0 %1993, %v74_v1   ;;  %v89_v3 = vld [vmem:[%s2620_s0 + $0x8] sm:$0xff]  ;;  %v90_v4 = vld [vmem:[%s2620_s0 + $0x10] sm:$0xff] }
   0xa   :  { %v91_v5 = vld [vmem:[%s2620_s0 + $0x18] sm:$0xff]  ;;  %v1968_v7 = vpack.c.bf16 %v89_v3, %v88_v2  ;;  %v92_v10 = vld [vmem:[%s2620_s0 + $0x20] sm:$0xff]  ;;  %v93_v11 = vld [vmem:[%s2620_s0 + $0x28] sm:$0xff] }
   0xb   :  { %v1972_v8 = vpack.c.bf16 %v91_v5, %v90_v4  ;;  %v1976_v12 = vpack.c.bf16 %v93_v11, %v92_v10  ;;  %v94_v13 = vld [vmem:[%s2620_s0 + $0x30] sm:$0xff]  ;;  %v95_v14 = vld [vmem:[%s2620_s0 + $0x38] sm:$0xff]  ;;  %v1674_v28 = vld [vmem:[%s2622_s27] ss:$0 sm:$0xff]  ;;  %s2625_s0 = sld [smem:[#allocation8_spill]] }
   0xc   :  { %1969 = vmatprep.subr.bf16.mxu0 %v1968_v7  ;;  %v1980_v17 = vpack.c.bf16 %v95_v14, %v94_v13  ;;  %v1675_v29 = vld [vmem:[%s2622_s27 + $0x1] ss:$0 sm:$0xff]  ;;  %v1677_v1 = vld [vmem:[%s2591_s7] ss:$0 sm:$0xff]  ;;  %s2098_s7 = smov 112   ;;  %s2103_s27 = smov 16  }
   0xd   :  { %80 = vperm.xlu0 %1993, %v75_v6   ;;  %1971 = vmatpush3.bf16.msra.mxu0 %v1968_v7  ;;  %v179_v15 = vld [vmem:[%s2621_s6] sm:$0xff]  ;;  %v180_v16 = vld [vmem:[%s2621_s6 + $0x8] sm:$0xff]  ;;  %s2102_s6 = smov 64  }
   0xe   :  { %1973 = vmatprep.subr.bf16.mxu0 %v1972_v8  ;;  %vm181_vm0 = vcmp.eq.s32.totalorder %v179_v15, 0  ;;  %vm182_vm1 = vcmp.eq.s32.totalorder %v180_v16, 0  ;;  %v96_v30 = vld [vmem:[%s2623_s29] sm:$0xff]  ;;  %v2006_v52 = vld [vmem:[%s2624_s8 + $0x8] sm:$0xff]  }
   0xf   :  { %v185_v18 = vsel %vm181_vm0, 1, %v2095_v0  ;;  %v186_v19 = vsel %vm182_vm1, 1, %v2095_v0  ;;  %v2005_v51 = vld [vmem:[%s2624_s8] sm:$0xff]  }
  0x10   :  { %188 = vperm.xlu1 %1994, %v185_v18   ;;  %1841 = vmatpush3.bf16.msra.mxu1 %v2005_v51  ;;  %v1678_v6 = vld [vmem:[%s2592_s9] ss:$0 sm:$0xff] }
  0x11   :  { %1975 = vmatpush3.bf16.msra.mxu0 %v1972_v8  ;;  %1842 = vmatprep.subr.bf16.mxu1 %v2096_v9  ;;  %v1676_v61 = vld [vmem:[%s2625_s0] ss:$0 sm:$0xff] }
  0x12   :  { %1977 = vmatprep.subr.bf16.mxu0 %v1976_v12 }
  0x14   :  { %191 = vperm.xlu1 %1994, %v186_v19   ;;  %1843 = vmatpush3.bf16.msra.mxu1 %v2006_v52 }
  0x15   :  { %1979 = vmatpush3.bf16.msra.mxu0 %v1976_v12  ;;  %1848 = vmatprep.subr.bf16.mxu1 %v2096_v9 }
  0x16   :  { %1981 = vmatprep.subr.bf16.mxu0 %v1980_v17 }
  0x19   :  { %1983 = vmatpush3.bf16.msra.mxu0 %v1980_v17 }
  0x1a   :  { %1854 = vmatprep.subr.bf16.mxu0 %v2096_v9 }
  0x88   :  { %v78_v22 = vpop.permute.xlu0 %77 }
  0x89   :  { %vm82_vm3 = vcmp.eq.s32.totalorder %v78_v22, %v73_v21 }
  0x8a   :  { %v1670_v23 = vsel %vm82_vm3, 1.0, %v2096_v9 }
  0x8b   :  { %1837 = vmatprep.mubr.msk.f32.mxu0 %vm97_vm2, %v1670_v23 }
  0x8c   :  { %v81_v24 = vpop.permute.xlu0 %80 }
  0x8d   :  { %vm83_vm4 = vcmp.eq.s32.totalorder %v81_v24, %v73_v21  ;;  %v2326_v21 = vld [vmem:[%s2593_s2] sm:$0xff] }
  0x8e   :  { %v1671_v25 = vsel %vm83_vm4, 1.0, %v2096_v9 }
  0x8f   :  { %1838 = vmatmul.mubr.msk.f32.vlgmr.msra.gmra.mrb[0].mxu0 %vm97_vm2, %v1671_v25  ;;  %v189_v26 = vpop.permute.xlu1 %188  ;;  %v2331_v25 = vld [vmem:[%s2593_s2 + $0x8] sm:$0xff]  ;;  %s2101_s2 = smov 48  }
  0x90   :  { %vm193_vm6 = vcmp.eq.s32.totalorder %v189_v26, 1  ;;  %1856 = vmatprep.mubr.msk.bf16.mxu0 %vm2097_vm8, %v2096_v9 }
  0x91   :  { %v203_v33 = vsel %vm193_vm6, %v1674_v28, %v1675_v29 }
  0x93   :  { %v192_v27 = vpop.permute.xlu1 %191 }
  0x94   :  { %vm194_vm5 = vcmp.eq.s32.totalorder %v192_v27, 1 }
  0x95   :  { %v204_v31 = vsel %vm194_vm5, %v1674_v28, %v1675_v29 }
 0x162   :  { %v1839_v32 = vpop.f32.mrb[0].mxu0 }
 0x163   :  { %v176_v34 = vadd.f32 %v1839_v32, %v96_v30  ;;  %v170_v35 = vpop.f32.mrb[1].mxu0 }
 0x164   :  { %v171_v36 = vadd.f32 %v170_v35, %v96_v30 }
 0x165   :  { %v206_v37 = vadd.f32 %v204_v31, %v176_v34 }
 0x166   :  { %v205_v38 = vadd.f32 %v203_v33, %v171_v36 }
 0x167   :  { %v213_v39 = vsel %vm209_vm7, %v206_v37, 0.0 }
 0x168   :  { %214 = vadd.xlane.f32.xlu1 %v213_v39  ;;  %v210_v40 = vsel %vm209_vm7, %v205_v38, 0.0 }
 0x169   :  { %211 = vadd.xlane.f32.xlu0 %v210_v40 }
 0x1f5   :  { %v215_v41 = vpop.xlane.xlu1 %214 }
 0x1f6   :  { %v218_v42 = vmul.f32 0.03125, %v215_v41  ;;  %v212_v43 = vpop.xlane.xlu0 %211 }
 0x1f7   :  { %v217_v44 = vmul.f32 0.03125, %v212_v43 }
 0x1f8   :  { %v220_v45 = vsub.f32 %v206_v37, %v218_v42 }
 0x1f9   :  { %v219_v46 = vsub.f32 %v205_v38, %v217_v44 }
 0x1fa   :  { %v222_v49 = vmul.f32 %v220_v45, %v220_v45 }
 0x1fb   :  { %v221_v47 = vmul.f32 %v219_v46, %v219_v46 }
 0x1fc   :  { %v226_v50 = vsel %vm209_vm7, %v222_v49, 0.0 }
 0x1fd   :  { %v223_v48 = vsel %vm209_vm7, %v221_v47, 0.0 }
 0x1fe   :  { %224 = vadd.xlane.f32.xlu0 %v223_v48 }
 0x202   :  { %227 = vadd.xlane.f32.xlu0 %v226_v50 }
 0x28b   :  { %v225_v53 = vpop.xlane.xlu0 %224 }
 0x28c   :  { %v229_v54 = vmul.f32 0.03125, %v225_v53 }
 0x28e   :  { %v231_v55 = vadd.f32 1e-12, %v229_v54 }
 0x28f   :  { %v228_v56 = vpop.xlane.xlu0 %227 }
 0x290   :  { %2027 = vrsqrt.f32 %v231_v55  ;;  %v230_v57 = vmul.f32 0.03125, %v228_v56 }
 0x292   :  { %v232_v58 = vadd.f32 1e-12, %v230_v57 }
 0x294   :  { %2029 = vrsqrt.f32 %v232_v58 }
 0x29a   :  { %v2028_v59 = vpop.eup %2027 }
 0x29b   :  { %v235_v60 = vmul.f32 %v2028_v59, %v219_v46 }
 0x29d   :  { %v243_v0 = vmul.f32 %v1676_v61, %v235_v60 }
 0x29e   :  { %v2030_v62 = vpop.eup %2029 }
 0x29f   :  { %v236_v63 = vmul.f32 %v2030_v62, %v220_v45  ;;  %v2292_v3 = vadd.f32 %v1677_v1, %v243_v0 }
 0x2a1   :  { %v244_v2 = vmul.f32 %v1676_v61, %v236_v63 }
 0x2a3   :  { %v2294_v4 = vadd.f32 %v1677_v1, %v244_v2 }
 0x2a5   :  { %v259_v5 = vpack.c.bf16 %v2294_v4, %v2292_v3 }
 0x2a7   :  { %1845 = vmatmul.mubr.msk.bf16.vlgmr.msra.gmra.mrb[0].mxu1 %vm209_vm7, %v259_v5 }
 0x2a8   :  { %1850 = vmatprep.mubr.msk.bf16.mxu1 %vm2097_vm8, %v2096_v9 }
 0x37a   :  { %v316_v7 = vpop.f32.mrb[0].mxu1 }
 0x37b   :  { %v1846_v8 = vpop.f32.mrb[1].mxu1  ;;  %v317_v11 = vadd.f32 %v1678_v6, %v316_v7 }
 0x37c   :  { %v319_v10 = vpop.f32.mrb[2].mxu1 }
 0x37d   :  { %v320_v12 = vadd.f32 %v1678_v6, %v319_v10  ;;  %v1847_v13 = vpop.f32.mrb[3].mxu1 }
 0x37f   :  { %v2304_v14 = vpack.c.bf16 %v320_v12, %v317_v11 }
 0x381   :  { %379 = vrot.lane.b32.xlu0 %v2304_v14, %s2098_s7  ;;  %381 = vrot.lane.b32.xlu1 %v2304_v14, %s2099_s30 }
 0x385   :  { %325 = vrot.lane.b32.xlu1 %v2304_v14, %s2100_s4 }
 0x3f3   :  { %v382_v15 = vpop.permute.xlu1 %381  ;;  %v380_v19 = vpop.permute.xlu0 %379 }
 0x3f4   :  { %v387_v16 = vsel %vm327_vm9, %v382_v15, 0 }
 0x3f5   :  { %1855 = vmatpush3.bf16.xpose.msra.mxu0 %v387_v16 }
 0x3f6   :  { %1866 = vmatprep.subr.bf16.mxu0 %v2096_v9 }
 0x3f7   :  { %v326_v17 = vpop.permute.xlu1 %325 }
 0x3f8   :  { %v332_v18 = vsel %vm327_vm9, %v326_v17, 0  ;;  %v2007_v17 = vld [vmem:[%s2594_s10] sm:$0xff]  }
 0x3f9   :  { %1849 = vmatpush3.bf16.xpose.msra.mxu1 %v332_v18  ;;  %v2008_v18 = vld [vmem:[%s2594_s10 + $0x8] sm:$0xff]  }
 0x3fa   :  { %1860 = vmatprep.subr.bf16.mxu1 %v2096_v9 }
 0x3fc   :  { %1857 = vmatmul.mubr.msk.bf16.vlgmr.msra.gmra.mrb[4].mxu0 %vm327_vm9, %v380_v19 }
 0x3fd   :  { %1868 = vmatprep.mubr.msk.bf16.mxu0 %vm2097_vm8, %v2096_v9 }
 0x400   :  { %1851 = vmatmul.mubr.msk.bf16.vlgmr.msra.gmra.mrb[4].mxu1 %vm327_vm9, %v2304_v14 }
 0x401   :  { %1862 = vmatprep.mubr.msk.bf16.mxu1 %vm2097_vm8, %v2096_v9 }
 0x4cf   :  { %v423_v20 = vpop.f32.mrb[4].mxu0 }
 0x4d0   :  { %v430_v22 = vmul.f32 0.25, %v423_v20  ;;  %v1858_v23 = vpop.f32.mrb[5].mxu0 }
 0x4d1   :  { %v426_v24 = vpop.f32.mrb[6].mxu0 }
 0x4d2   :  { %v431_v26 = vmul.f32 0.25, %v426_v24  ;;  %v1859_v27 = vpop.f32.mrb[7].mxu0  ;;  %v432_v28 = vadd.f32 %v430_v22, %v2326_v21 }
 0x4d3   :  { %v368_v29 = vpop.f32.mrb[4].mxu1 }
 0x4d4   :  { %v375_v30 = vmul.f32 0.25, %v368_v29  ;;  %v1852_v31 = vpop.f32.mrb[5].mxu1  ;;  %v440_v32 = vsel %vm327_vm9, %v432_v28, -inf  ;;  %v433_v33 = vadd.f32 %v431_v26, %v2331_v25 }
 0x4d5   :  { %441 = vmax.xlane.f32.xlu1 %v440_v32  ;;  %v371_v34 = vpop.f32.mrb[6].mxu1 }
 0x4d6   :  { %v376_v35 = vmul.f32 0.25, %v371_v34  ;;  %v1853_v36 = vpop.f32.mrb[7].mxu1  ;;  %v443_v37 = vsel %vm327_vm9, %v433_v33, -inf  ;;  %v377_v38 = vadd.f32 %v375_v30, %v2326_v21 }
 0x4d7   :  { %444 = vmax.xlane.f32.xlu0 %v443_v37  ;;  %v1686_v36 = vld [vmem:[%s2595_s11] ss:$0 sm:$0xff] }
 0x4d8   :  { %v378_v39 = vadd.f32 %v376_v35, %v2331_v25  ;;  %v434_v40 = vsel %vm327_vm9, %v377_v38, -inf }
 0x4da   :  { %v437_v41 = vsel %vm327_vm9, %v378_v39, -inf }
 0x4db   :  { %435 = vmax.xlane.f32.xlu0 %v434_v40  ;;  %438 = vmax.xlane.f32.xlu1 %v437_v41 }
 0x562   :  { %v442_v42 = vpop.xlane.xlu1 %441 }
 0x563   :  { %v448_v43 = vsub.f32 %v432_v28, %v442_v42 }
 0x564   :  { %v445_v44 = vpop.xlane.xlu0 %444 }
 0x565   :  { %v454_v45 = vmul.f32 1.442695, %v448_v43  ;;  %v449_v46 = vsub.f32 %v433_v33, %v445_v44 }
 0x567   :  { %2031 = vpow2.f32 %v454_v45  ;;  %v456_v47 = vmul.f32 1.442695, %v449_v46 }
 0x568   :  { %v436_v48 = vpop.xlane.xlu0 %435  ;;  %v439_v49 = vpop.xlane.xlu1 %438 }
 0x569   :  { %2033 = vpow2.f32 %v456_v47  ;;  %v446_v50 = vsub.f32 %v377_v38, %v436_v48  ;;  %v447_v51 = vsub.f32 %v378_v39, %v439_v49 }
 0x56b   :  { %v450_v52 = vmul.f32 1.442695, %v446_v50  ;;  %v452_v53 = vmul.f32 1.442695, %v447_v51 }
 0x56d   :  { %2035 = vpow2.f32 %v450_v52 }
 0x56e   :  { %2037 = vpow2.f32 %v452_v53 }
 0x571   :  { %v2032_v54 = vpop.eup %2031 }
 0x572   :  { %v464_v55 = vsel %vm327_vm9, %v2032_v54, 0.0 }
 0x573   :  { %v2034_v56 = vpop.eup %2033  ;;  %465 = vadd.xlane.f32.xlu0 %v464_v55 }
 0x574   :  { %v467_v57 = vsel %vm327_vm9, %v2034_v56, 0.0 }
 0x575   :  { %468 = vadd.xlane.f32.xlu1 %v467_v57 }
 0x577   :  { %v2036_v58 = vpop.eup %2035 }
 0x578   :  { %v458_v59 = vsel %vm327_vm9, %v2036_v58, 0.0  ;;  %v2038_v60 = vpop.eup %2037 }
 0x579   :  { %459 = vadd.xlane.f32.xlu1 %v458_v59  ;;  %v461_v61 = vsel %vm327_vm9, %v2038_v60, 0.0 }
 0x57d   :  { %462 = vadd.xlane.f32.xlu1 %v461_v61 }
 0x589   :  { %527 = vrot.lane.b32.xlu0 %v2304_v14, %s2101_s2 }
 0x58e   :  { %479 = vrot.lane.b32.xlu1 %v2304_v14, %s2102_s6 }
 0x600   :  { %v466_v62 = vpop.xlane.xlu0 %465 }
 0x601   :  { %2039 = vrcp.f32 %v466_v62 }
 0x602   :  { %v469_v63 = vpop.xlane.xlu1 %468 }
 0x603   :  { %2041 = vrcp.f32 %v469_v63 }
 0x604   :  { %v528_v0 = vpop.permute.xlu0 %527 }
 0x605   :  { %1867 = vmatpush3.bf16.msra.mxu0 %v528_v0 }
 0x606   :  { %v460_v1 = vpop.xlane.xlu1 %459  ;;  %1880 = vmatprep.subr.bf16.mxu0 %v2096_v9 }
 0x607   :  { %2043 = vrcp.f32 %v460_v1  ;;  %v1690_v1 = vld [vmem:[%s2597_s12] ss:$0 sm:$0xff] }
 0x60a   :  { %v463_v2 = vpop.xlane.xlu1 %462 }
 0x60b   :  { %v2040_v5 = vpop.eup %2039  ;;  %2045 = vrcp.f32 %v463_v2 }
 0x60c   :  { %v476_v7 = vmul.f32 %v2040_v5, %v2032_v54 }
 0x60d   :  { %v2042_v6 = vpop.eup %2041 }
 0x60e   :  { %v477_v8 = vmul.f32 %v2042_v6, %v2034_v56  ;;  %v480_v10 = vpop.permute.xlu1 %479  ;;  %v2010_v56 = vld [vmem:[%s2596_s14 + $0x8] sm:$0xff]  }
 0x60f   :  { %1861 = vmatpush3.bf16.msra.mxu1 %v480_v10 }
 0x610   :  { %v526_v11 = vpack.c.bf16 %v477_v8, %v476_v7  ;;  %1872 = vmatprep.subr.bf16.mxu1 %v2096_v9  ;;  %v1691_v7 = vld [vmem:[%s2598_s13] ss:$0 sm:$0xff] }
 0x611   :  { %v2044_v12 = vpop.eup %2043 }
 0x612   :  { %1869 = vmatmul.mubr.msk.bf16.vlgmr.msra.gmra.mrb[8].mxu0 %vm327_vm9, %v526_v11  ;;  %v474_v14 = vmul.f32 %v2044_v12, %v2036_v58 }
 0x613   :  { %1884 = vmatprep.mubr.msk.bf16.mxu0 %vm2097_vm8, %v2096_v9 }
 0x615   :  { %v2046_v13 = vpop.eup %2045 }
 0x616   :  { %v475_v15 = vmul.f32 %v2046_v13, %v2038_v60  ;;  %v2011_v13 = vld [vmem:[%s2599_s16] sm:$0xff]  }
 0x618   :  { %v478_v16 = vpack.c.bf16 %v475_v15, %v474_v14  ;;  %v2012_v14 = vld [vmem:[%s2599_s16 + $0x8] sm:$0xff]   ;;  %v2013_v15 = vld [vmem:[%s2599_s16 + $0x10] sm:$0xff]  }
 0x61a   :  { %1863 = vmatmul.mubr.msk.bf16.vlgmr.msra.gmra.mrb[8].mxu1 %vm327_vm9, %v478_v16  ;;  %v2014_v16 = vld [vmem:[%s2599_s16 + $0x18] sm:$0xff]  }
 0x61b   :  { %1876 = vmatprep.mubr.msk.bf16.mxu1 %vm2097_vm8, %v2096_v9  ;;  %1873 = vmatpush3.bf16.msra.mxu1 %v2007_v17  ;;  %v1692_v17 = vld [vmem:[%s2600_s15] ss:$0 sm:$0xff] }
 0x61c   :  { %1874 = vmatprep.subr.bf16.mxu1 %v2096_v9 }
 0x61f   :  { %1875 = vmatpush3.bf16.msra.mxu1 %v2008_v18 }
 0x620   :  { %1888 = vmatprep.subr.bf16.mxu1 %v2096_v9 }
 0x6e5   :  { %v567_v19 = vpop.f32.mrb[8].mxu0 }
 0x6e6   :  { %v1870_v20 = vpop.f32.mrb[9].mxu0 }
 0x6e7   :  { %v570_v22 = vpop.f32.mrb[10].mxu0 }
 0x6e8   :  { %v1995_v23 = vpack.i.bf16 %v570_v22, %v567_v19  ;;  %v1871_v24 = vpop.f32.mrb[11].mxu0 }
 0x6ea   :  { %1996 = vrot.lane.b32.xlu0 %v1995_v23, %s2103_s27 }
 0x6ed   :  { %v519_v26 = vpop.f32.mrb[8].mxu1 }
 0x6ee   :  { %v1864_v27 = vpop.f32.mrb[9].mxu1 }
 0x6ef   :  { %v522_v28 = vpop.f32.mrb[10].mxu1 }
 0x6f0   :  { %v1865_v29 = vpop.f32.mrb[11].mxu1 }
 0x75c   :  { %v1997_v30 = vpop.permute.xlu0 %1996 }
 0x75d   :  { %v1999_v31 = vunpack.i.h.bf16 %v1997_v30  ;;  %v1998_v32 = vunpack.i.l.bf16 %v1997_v30 }
 0x75f   :  { %v582_v33 = vsel %vm327_vm9, %v519_v26, %v1998_v32  ;;  %v583_v34 = vsel %vm327_vm9, %v522_v28, %v1999_v31 }
 0x760   :  { %v588_v35 = vpack.c.bf16 %v583_v34, %v582_v33 }
 0x762   :  { %1877 = vmatmul.mubr.msk.bf16.vlgmr.msra.gmra.mrb[12].mxu1 %vm209_vm7, %v588_v35 }
 0x763   :  { %1896 = vmatprep.mubr.msk.bf16.mxu1 %vm2097_vm8, %v2096_v9  ;;  %1889 = vmatpush3.bf16.msra.mxu1 %v2011_v13 }
 0x764   :  { %1890 = vmatprep.subr.bf16.mxu1 %v2096_v9 }
 0x767   :  { %1891 = vmatpush3.bf16.msra.mxu1 %v2012_v14 }
 0x768   :  { %1892 = vmatprep.subr.bf16.mxu1 %v2096_v9 }
 0x76b   :  { %1893 = vmatpush3.bf16.msra.mxu1 %v2013_v15 }
 0x76c   :  { %1894 = vmatprep.subr.bf16.mxu1 %v2096_v9 }
 0x76f   :  { %1895 = vmatpush3.bf16.msra.mxu1 %v2014_v16 }
 0x770   :  { %1914 = vmatprep.subr.bf16.mxu1 %v2096_v9 }
 0x835   :  { %v645_v37 = vpop.f32.mrb[12].mxu1 }
 0x836   :  { %v646_v38 = vadd.f32 %v1686_v36, %v645_v37  ;;  %v1878_v39 = vpop.f32.mrb[13].mxu1 }
 0x837   :  { %v648_v40 = vpop.f32.mrb[14].mxu1 }
 0x838   :  { %v649_v41 = vadd.f32 %v1686_v36, %v648_v40  ;;  %v1879_v42 = vpop.f32.mrb[15].mxu1  ;;  %v652_v43 = vadd.f32 %v646_v38, %v2292_v3 }
 0x83a   :  { %v656_v44 = vsel %vm209_vm7, %v652_v43, 0.0  ;;  %v653_v45 = vadd.f32 %v649_v41, %v2294_v4  ;;  %v2009_v4 = vld [vmem:[%s2596_s14] sm:$0xff]  }
 0x83b   :  { %657 = vadd.xlane.f32.xlu0 %v656_v44  ;;  %1881 = vmatpush3.bf16.msra.mxu0 %v2009_v4 }
 0x83c   :  { %v659_v46 = vsel %vm209_vm7, %v653_v45, 0.0  ;;  %1882 = vmatprep.subr.bf16.mxu0 %v2096_v9 }
 0x83d   :  { %660 = vadd.xlane.f32.xlu1 %v659_v46 }
 0x83f   :  { %1883 = vmatpush3.bf16.msra.mxu0 %v2010_v56 }
 0x840   :  { %1900 = vmatprep.subr.bf16.mxu0 %v2096_v9 }
 0x8c8   :  { %v658_v47 = vpop.xlane.xlu0 %657 }
 0x8c9   :  { %v662_v48 = vmul.f32 0.03125, %v658_v47 }
 0x8ca   :  { %v661_v49 = vpop.xlane.xlu1 %660 }
 0x8cb   :  { %v664_v50 = vsub.f32 %v652_v43, %v662_v48  ;;  %v663_v51 = vmul.f32 0.03125, %v661_v49 }
 0x8cd   :  { %v665_v52 = vsub.f32 %v653_v45, %v663_v51  ;;  %v666_v53 = vmul.f32 %v664_v50, %v664_v50  ;;  %v1696_v45 = vld [vmem:[%s2601_s17] ss:$0 sm:$0xff] }
 0x8cf   :  { %v668_v54 = vsel %vm209_vm7, %v666_v53, 0.0  ;;  %v667_v55 = vmul.f32 %v665_v52, %v665_v52 }
 0x8d0   :  { %669 = vadd.xlane.f32.xlu0 %v668_v54 }
 0x8d1   :  { %v671_v3 = vsel %vm209_vm7, %v667_v55, 0.0 }
 0x8d4   :  { %672 = vadd.xlane.f32.xlu0 %v671_v3 }
 0x95d   :  { %v670_v57 = vpop.xlane.xlu0 %669 }
 0x95e   :  { %v674_v58 = vmul.f32 0.03125, %v670_v57 }
 0x960   :  { %v676_v59 = vadd.f32 1e-12, %v674_v58 }
 0x961   :  { %v673_v60 = vpop.xlane.xlu0 %672 }
 0x962   :  { %2047 = vrsqrt.f32 %v676_v59  ;;  %v675_v61 = vmul.f32 0.03125, %v673_v60 }
 0x964   :  { %v677_v62 = vadd.f32 1e-12, %v675_v61 }
 0x966   :  { %2049 = vrsqrt.f32 %v677_v62 }
 0x96c   :  { %v2048_v63 = vpop.eup %2047 }
 0x96d   :  { %v680_v0 = vmul.f32 %v2048_v63, %v664_v50 }
 0x96f   :  { %v688_v5 = vmul.f32 %v1690_v1, %v680_v0  ;;  %v2015_v0 = vld [vmem:[%s2624_s8 + $0x10] sm:$0xff]  }
 0x970   :  { %v2050_v2 = vpop.eup %2049 }
 0x971   :  { %v681_v6 = vmul.f32 %v2050_v2, %v665_v52  ;;  %v696_v10 = vadd.f32 %v1691_v7, %v688_v5 }
 0x973   :  { %v689_v8 = vmul.f32 %v1690_v1, %v681_v6  ;;  %v2016_v1 = vld [vmem:[%s2624_s8 + $0x18] sm:$0xff]  }
 0x975   :  { %v697_v11 = vadd.f32 %v1691_v7, %v689_v8 }
 0x977   :  { %v702_v12 = vpack.c.bf16 %v697_v11, %v696_v10 }
 0x979   :  { %1885 = vmatmul.mubr.msk.bf16.vlgmr.msra.gmra.mrb[12].mxu0 %vm209_vm7, %v702_v12  ;;  %v1702_v12 = vld [vmem:[%s2602_s18] ss:$0 sm:$0xff] }
 0x97a   :  { %1904 = vmatprep.mubr.msk.bf16.mxu0 %vm2097_vm8, %v2096_v9  ;;  %1901 = vmatpush3.bf16.msra.mxu0 %v2015_v0 }
 0x97b   :  { %1902 = vmatprep.subr.bf16.mxu0 %v2096_v9 }
 0x97e   :  { %1903 = vmatpush3.bf16.msra.mxu0 %v2016_v1 }
 0x97f   :  { %1908 = vmatprep.subr.bf16.mxu0 %v2096_v9 }
 0xa4c   :  { %v759_v18 = vpop.f32.mrb[12].mxu0 }
 0xa4d   :  { %v760_v19 = vadd.f32 %v1692_v17, %v759_v18  ;;  %v1886_v20 = vpop.f32.mrb[13].mxu0 }
 0xa4e   :  { %v762_v22 = vpop.f32.mrb[14].mxu0 }
 0xa4f   :  { %v768_v23 = vmul.f32 0.044715, %v760_v19  ;;  %v763_v24 = vadd.f32 %v1692_v17, %v762_v22  ;;  %v1887_v26 = vpop.f32.mrb[15].mxu0  ;;  %v766_v39 = vmul.f32 0.5, %v760_v19  ;;  %v1703_v17 = vld [vmem:[%s2603_s19] ss:$0 sm:$0xff] }
 0xa51   :  { %v770_v27 = vmul.f32 %v768_v23, %v760_v19  ;;  %v769_v28 = vmul.f32 0.044715, %v763_v24  ;;  %v767_v40 = vmul.f32 0.5, %v763_v24  ;;  %v1709_v23 = vld [vmem:[%s2592_s9 + $0x1] ss:$0 sm:$0xff] }
 0xa53   :  { %v772_v29 = vmul.f32 %v770_v27, %v760_v19  ;;  %v771_v30 = vmul.f32 %v769_v28, %v763_v24 }
 0xa55   :  { %v774_v31 = vadd.f32 %v772_v29, %v760_v19  ;;  %v773_v32 = vmul.f32 %v771_v30, %v763_v24 }
 0xa57   :  { %v776_v33 = vmul.f32 0.7978846, %v774_v31  ;;  %v775_v34 = vadd.f32 %v773_v32, %v763_v24 }
 0xa59   :  { %2051 = vtanh.f32 %v776_v33  ;;  %v777_v35 = vmul.f32 0.7978846, %v775_v34 }
 0xa5b   :  { %2053 = vtanh.f32 %v777_v35 }
 0xa63   :  { %v2052_v36 = vpop.eup %2051 }
 0xa64   :  { %v780_v37 = vadd.f32 1.0, %v2052_v36 }
 0xa65   :  { %v2054_v38 = vpop.eup %2053 }
 0xa66   :  { %v781_v41 = vadd.f32 1.0, %v2054_v38  ;;  %v782_v42 = vmul.f32 %v780_v37, %v766_v39 }
 0xa68   :  { %v783_v43 = vmul.f32 %v781_v41, %v767_v40 }
 0xa6a   :  { %v792_v44 = vpack.c.bf16 %v783_v43, %v782_v42 }
 0xa6c   :  { %1897 = vmatmul.mubr.msk.bf16.vlgmr.msra.gmra.mrb[16].mxu1 %vm97_vm2, %v792_v44 }
 0xa6d   :  { %1916 = vmatprep.mubr.msk.bf16.mxu1 %vm2097_vm8, %v2096_v9 }
 0xb3f   :  { %v861_v46 = vpop.f32.mrb[16].mxu1 }
 0xb40   :  { %v862_v47 = vadd.f32 %v1696_v45, %v861_v46  ;;  %v1898_v48 = vpop.f32.mrb[17].mxu1 }
 0xb41   :  { %v864_v49 = vpop.f32.mrb[18].mxu1 }
 0xb42   :  { %v865_v50 = vadd.f32 %v1696_v45, %v864_v49  ;;  %v1899_v51 = vpop.f32.mrb[19].mxu1  ;;  %v868_v52 = vadd.f32 %v862_v47, %v696_v10 }
 0xb44   :  { %v872_v53 = vsel %vm209_vm7, %v868_v52, 0.0  ;;  %v869_v54 = vadd.f32 %v865_v50, %v697_v11 }
 0xb45   :  { %873 = vadd.xlane.f32.xlu1 %v872_v53 }
 0xb46   :  { %v875_v55 = vsel %vm209_vm7, %v869_v54, 0.0 }
 0xb47   :  { %876 = vadd.xlane.f32.xlu0 %v875_v55 }
 0xbd2   :  { %v874_v3 = vpop.xlane.xlu1 %873 }
 0xbd3   :  { %v878_v4 = vmul.f32 0.03125, %v874_v3 }
 0xbd4   :  { %v877_v56 = vpop.xlane.xlu0 %876 }
 0xbd5   :  { %v880_v57 = vsub.f32 %v868_v52, %v878_v4  ;;  %v879_v58 = vmul.f32 0.03125, %v877_v56 }
 0xbd7   :  { %v881_v59 = vsub.f32 %v869_v54, %v879_v58  ;;  %v882_v60 = vmul.f32 %v880_v57, %v880_v57 }
 0xbd9   :  { %v884_v61 = vsel %vm209_vm7, %v882_v60, 0.0  ;;  %v883_v62 = vmul.f32 %v881_v59, %v881_v59 }
 0xbda   :  { %885 = vadd.xlane.f32.xlu1 %v884_v61 }
 0xbdb   :  { %v887_v63 = vsel %vm209_vm7, %v883_v62, 0.0 }
 0xbdc   :  { %888 = vadd.xlane.f32.xlu0 %v887_v63 }
 0xc67   :  { %v886_v2 = vpop.xlane.xlu1 %885 }
 0xc68   :  { %v890_v5 = vmul.f32 0.03125, %v886_v2 }
 0xc69   :  { %v889_v6 = vpop.xlane.xlu0 %888 }
 0xc6a   :  { %v892_v7 = vadd.f32 1e-12, %v890_v5  ;;  %v891_v8 = vmul.f32 0.03125, %v889_v6 }
 0xc6c   :  { %2055 = vrsqrt.f32 %v892_v7  ;;  %v893_v10 = vadd.f32 1e-12, %v891_v8 }
 0xc6e   :  { %2057 = vrsqrt.f32 %v893_v10 }
 0xc76   :  { %v2056_v11 = vpop.eup %2055 }
 0xc77   :  { %v896_v13 = vmul.f32 %v2056_v11, %v880_v57 }
 0xc78   :  { %v2058_v14 = vpop.eup %2057 }
 0xc79   :  { %v904_v15 = vmul.f32 %v1702_v12, %v896_v13  ;;  %v897_v16 = vmul.f32 %v2058_v14, %v881_v59 }
 0xc7b   :  { %v905_v18 = vmul.f32 %v1702_v12, %v897_v16  ;;  %v2440_v19 = vadd.f32 %v1703_v17, %v904_v15 }
 0xc7d   :  { %v2442_v20 = vadd.f32 %v1703_v17, %v905_v18 }
 0xc7f   :  { %v919_v22 = vpack.c.bf16 %v2442_v20, %v2440_v19 }
 0xc81   :  { %1905 = vmatmul.mubr.msk.bf16.vlgmr.msra.gmra.mrb[16].mxu0 %vm209_vm7, %v919_v22 }
 0xc82   :  { %1910 = vmatprep.mubr.msk.bf16.mxu0 %vm2097_vm8, %v2096_v9 }
 0xd54   :  { %v977_v24 = vpop.f32.mrb[16].mxu0 }
 0xd55   :  { %v1906_v26 = vpop.f32.mrb[17].mxu0  ;;  %v978_v28 = vadd.f32 %v1709_v23, %v977_v24 }
 0xd56   :  { %v980_v27 = vpop.f32.mrb[18].mxu0 }
 0xd57   :  { %v981_v29 = vadd.f32 %v1709_v23, %v980_v27  ;;  %v1907_v30 = vpop.f32.mrb[19].mxu0 }
 0xd59   :  { %v2452_v31 = vpack.c.bf16 %v981_v29, %v978_v28 }
 0xd5b   :  { %1039 = vrot.lane.b32.xlu0 %v2452_v31, %s2098_s7  ;;  %1041 = vrot.lane.b32.xlu1 %v2452_v31, %s2099_s30 }
 0xd5f   :  { %986 = vrot.lane.b32.xlu1 %v2452_v31, %s2100_s4 }
 0xdcd   :  { %v1042_v32 = vpop.permute.xlu1 %1041  ;;  %v1040_v36 = vpop.permute.xlu0 %1039 }
 0xdce   :  { %v1047_v33 = vsel %vm327_vm9, %v1042_v32, 0  ;;  %v2017_v32 = vld [vmem:[%s2594_s10 + $0x10] sm:$0xff]  }
 0xdcf   :  { %1915 = vmatpush3.bf16.xpose.msra.mxu1 %v1047_v33  ;;  %v2018_v33 = vld [vmem:[%s2594_s10 + $0x18] sm:$0xff]  }
 0xdd0   :  { %1926 = vmatprep.subr.bf16.mxu1 %v2096_v9 }
 0xdd1   :  { %v987_v34 = vpop.permute.xlu1 %986 }
 0xdd2   :  { %v992_v35 = vsel %vm327_vm9, %v987_v34, 0 }
 0xdd3   :  { %1909 = vmatpush3.bf16.xpose.msra.mxu0 %v992_v35 }
 0xdd4   :  { %1920 = vmatprep.subr.bf16.mxu0 %v2096_v9 }
 0xdd6   :  { %1917 = vmatmul.mubr.msk.bf16.vlgmr.msra.gmra.mrb[20].mxu1 %vm327_vm9, %v1040_v36 }
 0xdd7   :  { %1928 = vmatprep.mubr.msk.bf16.mxu1 %vm2097_vm8, %v2096_v9 }
 0xdda   :  { %1911 = vmatmul.mubr.msk.bf16.vlgmr.msra.gmra.mrb[20].mxu0 %vm327_vm9, %v2452_v31 }
 0xddb   :  { %1922 = vmatprep.mubr.msk.bf16.mxu0 %vm2097_vm8, %v2096_v9 }
 0xea9   :  { %v1083_v37 = vpop.f32.mrb[20].mxu1 }
 0xeaa   :  { %v1090_v38 = vmul.f32 0.25, %v1083_v37  ;;  %v1918_v39 = vpop.f32.mrb[21].mxu1 }
 0xeab   :  { %v1086_v40 = vpop.f32.mrb[22].mxu1 }
 0xeac   :  { %v1091_v41 = vmul.f32 0.25, %v1086_v40  ;;  %v1919_v42 = vpop.f32.mrb[23].mxu1  ;;  %v1092_v43 = vadd.f32 %v1090_v38, %v2326_v21 }
 0xead   :  { %v1028_v44 = vpop.f32.mrb[20].mxu0 }
 0xeae   :  { %v1035_v45 = vmul.f32 0.25, %v1028_v44  ;;  %v1912_v46 = vpop.f32.mrb[21].mxu0  ;;  %v1100_v47 = vsel %vm327_vm9, %v1092_v43, -inf  ;;  %v1093_v48 = vadd.f32 %v1091_v41, %v2331_v25 }
 0xeaf   :  { %v1031_v49 = vpop.f32.mrb[22].mxu0  ;;  %1101 = vmax.xlane.f32.xlu1 %v1100_v47 }
 0xeb0   :  { %v1036_v50 = vmul.f32 0.25, %v1031_v49  ;;  %v1913_v51 = vpop.f32.mrb[23].mxu0  ;;  %v1103_v52 = vsel %vm327_vm9, %v1093_v48, -inf  ;;  %v1037_v53 = vadd.f32 %v1035_v45, %v2326_v21  ;;  %v1722_v49 = vld [vmem:[%s2595_s11 + $0x1] ss:$0 sm:$0xff] }
 0xeb1   :  { %1104 = vmax.xlane.f32.xlu0 %v1103_v52 }
 0xeb2   :  { %v1038_v54 = vadd.f32 %v1036_v50, %v2331_v25  ;;  %v1094_v3 = vsel %vm327_vm9, %v1037_v53, -inf }
 0xeb4   :  { %v1097_v55 = vsel %vm327_vm9, %v1038_v54, -inf }
 0xeb5   :  { %1098 = vmax.xlane.f32.xlu1 %v1097_v55  ;;  %1095 = vmax.xlane.f32.xlu0 %v1094_v3 }
 0xf3c   :  { %v1102_v4 = vpop.xlane.xlu1 %1101 }
 0xf3d   :  { %v1108_v56 = vsub.f32 %v1092_v43, %v1102_v4 }
 0xf3e   :  { %v1105_v57 = vpop.xlane.xlu0 %1104 }
 0xf3f   :  { %v1114_v58 = vmul.f32 1.442695, %v1108_v56  ;;  %v1109_v59 = vsub.f32 %v1093_v48, %v1105_v57 }
 0xf41   :  { %2059 = vpow2.f32 %v1114_v58  ;;  %v1116_v60 = vmul.f32 1.442695, %v1109_v59 }
 0xf42   :  { %v1099_v61 = vpop.xlane.xlu1 %1098  ;;  %v1096_v62 = vpop.xlane.xlu0 %1095 }
 0xf43   :  { %2061 = vpow2.f32 %v1116_v60  ;;  %v1107_v21 = vsub.f32 %v1038_v54, %v1099_v61  ;;  %v1106_v63 = vsub.f32 %v1037_v53, %v1096_v62 }
 0xf45   :  { %v1110_v0 = vmul.f32 1.442695, %v1106_v63  ;;  %v1112_v25 = vmul.f32 1.442695, %v1107_v21 }
 0xf47   :  { %2063 = vpow2.f32 %v1110_v0 }
 0xf48   :  { %2065 = vpow2.f32 %v1112_v25 }
 0xf4b   :  { %v2060_v1 = vpop.eup %2059 }
 0xf4c   :  { %v1124_v2 = vsel %vm327_vm9, %v2060_v1, 0.0 }
 0xf4d   :  { %v2062_v5 = vpop.eup %2061  ;;  %1125 = vadd.xlane.f32.xlu0 %v1124_v2 }
 0xf4e   :  { %v1127_v6 = vsel %vm327_vm9, %v2062_v5, 0.0 }
 0xf4f   :  { %1128 = vadd.xlane.f32.xlu1 %v1127_v6 }
 0xf51   :  { %v2064_v7 = vpop.eup %2063 }
 0xf52   :  { %v1118_v8 = vsel %vm327_vm9, %v2064_v7, 0.0  ;;  %v2066_v10 = vpop.eup %2065 }
 0xf53   :  { %1119 = vadd.xlane.f32.xlu1 %v1118_v8  ;;  %v1121_v11 = vsel %vm327_vm9, %v2066_v10, 0.0 }
 0xf57   :  { %1122 = vadd.xlane.f32.xlu1 %v1121_v11 }
 0xf63   :  { %1187 = vrot.lane.b32.xlu0 %v2452_v31, %s2101_s2 }
 0xf68   :  { %1139 = vrot.lane.b32.xlu1 %v2452_v31, %s2102_s6 }
 0xfda   :  { %v1126_v12 = vpop.xlane.xlu0 %1125 }
 0xfdb   :  { %2067 = vrcp.f32 %v1126_v12 }
 0xfdc   :  { %v1129_v13 = vpop.xlane.xlu1 %1128 }
 0xfdd   :  { %2069 = vrcp.f32 %v1129_v13  ;;  %v1728_v13 = vld [vmem:[%s2597_s12 + $0x1] ss:$0 sm:$0xff] }
 0xfde   :  { %v1188_v14 = vpop.permute.xlu0 %1187 }
 0xfdf   :  { %1927 = vmatpush3.bf16.msra.mxu1 %v1188_v14 }
 0xfe0   :  { %1940 = vmatprep.subr.bf16.mxu1 %v2096_v9  ;;  %v1120_v15 = vpop.xlane.xlu1 %1119 }
 0xfe1   :  { %2071 = vrcp.f32 %v1120_v15 }
 0xfe4   :  { %v1123_v17 = vpop.xlane.xlu1 %1122 }
 0xfe5   :  { %v2068_v16 = vpop.eup %2067  ;;  %2073 = vrcp.f32 %v1123_v17  ;;  %v1729_v17 = vld [vmem:[%s2598_s13 + $0x1] ss:$0 sm:$0xff] }
 0xfe6   :  { %v1136_v22 = vmul.f32 %v2068_v16, %v2060_v1  ;;  %v2020_v1 = vld [vmem:[%s2596_s14 + $0x18] sm:$0xff]  }
 0xfe7   :  { %v2070_v18 = vpop.eup %2069 }
 0xfe8   :  { %v1137_v23 = vmul.f32 %v2070_v18, %v2062_v5  ;;  %v1140_v24 = vpop.permute.xlu1 %1139 }
 0xfe9   :  { %1921 = vmatpush3.bf16.msra.mxu0 %v1140_v24 }
 0xfea   :  { %v1186_v26 = vpack.c.bf16 %v1137_v23, %v1136_v22  ;;  %1932 = vmatprep.subr.bf16.mxu0 %v2096_v9 }
 0xfeb   :  { %v2072_v27 = vpop.eup %2071 }
 0xfec   :  { %1929 = vmatmul.mubr.msk.bf16.vlgmr.msra.gmra.mrb[24].mxu1 %vm327_vm9, %v1186_v26  ;;  %v1134_v29 = vmul.f32 %v2072_v27, %v2064_v7  ;;  %v2021_v26 = vld [vmem:[%s2599_s16 + $0x20] sm:$0xff]   ;;  %v2022_v27 = vld [vmem:[%s2599_s16 + $0x28] sm:$0xff]  }
 0xfed   :  { %1944 = vmatprep.mubr.msk.bf16.mxu1 %vm2097_vm8, %v2096_v9 }
 0xfef   :  { %v2074_v28 = vpop.eup %2073 }
 0xff0   :  { %v1135_v30 = vmul.f32 %v2074_v28, %v2066_v10  ;;  %v2023_v28 = vld [vmem:[%s2599_s16 + $0x30] sm:$0xff]  }
 0xff2   :  { %v1138_v31 = vpack.c.bf16 %v1135_v30, %v1134_v29  ;;  %v2024_v29 = vld [vmem:[%s2599_s16 + $0x38] sm:$0xff]   ;;  %v1735_v30 = vld [vmem:[%s2600_s15 + $0x1] ss:$0 sm:$0xff] }
 0xff4   :  { %1923 = vmatmul.mubr.msk.bf16.vlgmr.msra.gmra.mrb[24].mxu0 %vm327_vm9, %v1138_v31 }
 0xff5   :  { %1936 = vmatprep.mubr.msk.bf16.mxu0 %vm2097_vm8, %v2096_v9  ;;  %1933 = vmatpush3.bf16.msra.mxu0 %v2017_v32 }
 0xff6   :  { %1934 = vmatprep.subr.bf16.mxu0 %v2096_v9 }
 0xff9   :  { %1935 = vmatpush3.bf16.msra.mxu0 %v2018_v33 }
 0xffa   :  { %1948 = vmatprep.subr.bf16.mxu0 %v2096_v9 }
0x10bf   :  { %v1227_v34 = vpop.f32.mrb[24].mxu1 }
0x10c0   :  { %v1930_v35 = vpop.f32.mrb[25].mxu1 }
0x10c1   :  { %v1230_v36 = vpop.f32.mrb[26].mxu1 }
0x10c2   :  { %v2000_v37 = vpack.i.bf16 %v1230_v36, %v1227_v34  ;;  %v1931_v38 = vpop.f32.mrb[27].mxu1 }
0x10c4   :  { %2001 = vrot.lane.b32.xlu0 %v2000_v37, %s2103_s27 }
0x10c7   :  { %v1179_v39 = vpop.f32.mrb[24].mxu0 }
0x10c8   :  { %v1924_v40 = vpop.f32.mrb[25].mxu0 }
0x10c9   :  { %v1182_v41 = vpop.f32.mrb[26].mxu0 }
0x10ca   :  { %v1925_v42 = vpop.f32.mrb[27].mxu0 }
0x1136   :  { %v2002_v43 = vpop.permute.xlu0 %2001 }
0x1137   :  { %v2004_v44 = vunpack.i.h.bf16 %v2002_v43  ;;  %v2003_v45 = vunpack.i.l.bf16 %v2002_v43 }
0x1139   :  { %v1243_v46 = vsel %vm327_vm9, %v1182_v41, %v2004_v44  ;;  %v1242_v47 = vsel %vm327_vm9, %v1179_v39, %v2003_v45 }
0x113a   :  { %v1249_v48 = vpack.c.bf16 %v1243_v46, %v1242_v47 }
0x113c   :  { %1937 = vmatmul.mubr.msk.bf16.vlgmr.msra.gmra.mrb[28].mxu0 %vm209_vm7, %v1249_v48 }
0x113d   :  { %1956 = vmatprep.mubr.msk.bf16.mxu0 %vm2097_vm8, %v2096_v9  ;;  %1949 = vmatpush3.bf16.msra.mxu0 %v2021_v26 }
0x113e   :  { %1950 = vmatprep.subr.bf16.mxu0 %v2096_v9 }
0x1141   :  { %1951 = vmatpush3.bf16.msra.mxu0 %v2022_v27 }
0x1142   :  { %1952 = vmatprep.subr.bf16.mxu0 %v2096_v9 }
0x1145   :  { %1953 = vmatpush3.bf16.msra.mxu0 %v2023_v28 }
0x1146   :  { %1954 = vmatprep.subr.bf16.mxu0 %v2096_v9 }
0x1149   :  { %1955 = vmatpush3.bf16.msra.mxu0 %v2024_v29 }
0x120f   :  { %v1307_v50 = vpop.f32.mrb[28].mxu0 }
0x1210   :  { %v1308_v51 = vadd.f32 %v1722_v49, %v1307_v50  ;;  %v1938_v52 = vpop.f32.mrb[29].mxu0 }
0x1211   :  { %v1310_v53 = vpop.f32.mrb[30].mxu0 }
0x1212   :  { %v1311_v54 = vadd.f32 %v1722_v49, %v1310_v53  ;;  %v1939_v55 = vpop.f32.mrb[31].mxu0  ;;  %v1314_v3 = vadd.f32 %v1308_v51, %v2440_v19 }
0x1214   :  { %v1320_v4 = vsel %vm209_vm7, %v1314_v3, 0.0  ;;  %v1315_v56 = vadd.f32 %v1311_v54, %v2442_v20  ;;  %v2019_v20 = vld [vmem:[%s2596_s14 + $0x10] sm:$0xff]  }
0x1215   :  { %1321 = vadd.xlane.f32.xlu0 %v1320_v4  ;;  %1941 = vmatpush3.bf16.msra.mxu1 %v2019_v20 }
0x1216   :  { %v1323_v57 = vsel %vm209_vm7, %v1315_v56, 0.0  ;;  %1942 = vmatprep.subr.bf16.mxu1 %v2096_v9 }
0x1217   :  { %1324 = vadd.xlane.f32.xlu1 %v1323_v57 }
0x1219   :  { %1943 = vmatpush3.bf16.msra.mxu1 %v2020_v1 }
0x121a   :  { %1960 = vmatprep.subr.bf16.mxu1 %v2096_v9 }
0x12a2   :  { %v1322_v58 = vpop.xlane.xlu0 %1321 }
0x12a3   :  { %v1326_v59 = vmul.f32 0.03125, %v1322_v58 }
0x12a4   :  { %v1325_v60 = vpop.xlane.xlu1 %1324 }
0x12a5   :  { %v1328_v61 = vsub.f32 %v1314_v3, %v1326_v59  ;;  %v1327_v62 = vmul.f32 0.03125, %v1325_v60  ;;  %v1748_v3 = vld [vmem:[%s2601_s17 + $0x1] ss:$0 sm:$0xff] }
0x12a7   :  { %v1329_v21 = vsub.f32 %v1315_v56, %v1327_v62  ;;  %v1330_v63 = vmul.f32 %v1328_v61, %v1328_v61 }
0x12a9   :  { %v1332_v0 = vsel %vm209_vm7, %v1330_v63, 0.0  ;;  %v1331_v25 = vmul.f32 %v1329_v21, %v1329_v21 }
0x12aa   :  { %1333 = vadd.xlane.f32.xlu0 %v1332_v0 }
0x12ab   :  { %v1335_v19 = vsel %vm209_vm7, %v1331_v25, 0.0 }
0x12ae   :  { %1336 = vadd.xlane.f32.xlu0 %v1335_v19 }
0x1337   :  { %v1334_v2 = vpop.xlane.xlu0 %1333 }
0x1338   :  { %v1338_v5 = vmul.f32 0.03125, %v1334_v2 }
0x133a   :  { %v1340_v6 = vadd.f32 1e-12, %v1338_v5 }
0x133b   :  { %v1337_v7 = vpop.xlane.xlu0 %1336 }
0x133c   :  { %2075 = vrsqrt.f32 %v1340_v6  ;;  %v1339_v8 = vmul.f32 0.03125, %v1337_v7 }
0x133e   :  { %v1341_v10 = vadd.f32 1e-12, %v1339_v8 }
0x1340   :  { %2077 = vrsqrt.f32 %v1341_v10  ;;  %v2025_v10 = vld [vmem:[%s2604_s20] sm:$0xff]  }
0x1346   :  { %v2076_v11 = vpop.eup %2075 }
0x1347   :  { %v1344_v12 = vmul.f32 %v2076_v11, %v1328_v61  ;;  %v2026_v11 = vld [vmem:[%s2604_s20 + $0x8] sm:$0xff]  }
0x1349   :  { %v1352_v15 = vmul.f32 %v1728_v13, %v1344_v12 }
0x134a   :  { %v2078_v14 = vpop.eup %2077 }
0x134b   :  { %v1345_v16 = vmul.f32 %v2078_v14, %v1329_v21  ;;  %v1360_v22 = vadd.f32 %v1729_v17, %v1352_v15 }
0x134d   :  { %v1353_v18 = vmul.f32 %v1728_v13, %v1345_v16 }
0x134f   :  { %v1361_v23 = vadd.f32 %v1729_v17, %v1353_v18 }
0x1351   :  { %v1367_v24 = vpack.c.bf16 %v1361_v23, %v1360_v22 }
0x1353   :  { %1945 = vmatmul.mubr.msk.bf16.vlgmr.msra.gmra.mrb[28].mxu1 %vm209_vm7, %v1367_v24 }
0x1354   :  { %1964 = vmatprep.mubr.msk.bf16.mxu1 %vm2097_vm8, %v2096_v9  ;;  %1961 = vmatpush3.bf16.msra.mxu1 %v2025_v10 }
0x1355   :  { %1962 = vmatprep.subr.bf16.mxu1 %v2096_v9  ;;  %v1757_v9 = vld [vmem:[%s2603_s19 + $0x1] ss:$0 sm:$0xff] }
0x1358   :  { %1963 = vmatpush3.bf16.msra.mxu1 %v2026_v11 }
0x1426   :  { %v1425_v31 = vpop.f32.mrb[28].mxu1 }
0x1427   :  { %v1426_v32 = vadd.f32 %v1735_v30, %v1425_v31  ;;  %v1946_v33 = vpop.f32.mrb[29].mxu1 }
0x1428   :  { %v1428_v34 = vpop.f32.mrb[30].mxu1 }
0x1429   :  { %v1434_v35 = vmul.f32 0.044715, %v1426_v32  ;;  %v1429_v36 = vadd.f32 %v1735_v30, %v1428_v34  ;;  %v1947_v37 = vpop.f32.mrb[31].mxu1  ;;  %v1432_v50 = vmul.f32 0.5, %v1426_v32 }
0x142b   :  { %v1436_v38 = vmul.f32 %v1434_v35, %v1426_v32  ;;  %v1435_v39 = vmul.f32 0.044715, %v1429_v36  ;;  %v1433_v51 = vmul.f32 0.5, %v1429_v36 }
0x142d   :  { %v1438_v40 = vmul.f32 %v1436_v38, %v1426_v32  ;;  %v1437_v41 = vmul.f32 %v1435_v39, %v1429_v36 }
0x142f   :  { %v1440_v42 = vadd.f32 %v1438_v40, %v1426_v32  ;;  %v1439_v43 = vmul.f32 %v1437_v41, %v1429_v36  ;;  %v1758_v32 = vld [vmem:[%s2605_s21] ss:$0 sm:$0xff] }
0x1431   :  { %v1442_v44 = vmul.f32 0.7978846, %v1440_v42  ;;  %v1441_v45 = vadd.f32 %v1439_v43, %v1429_v36 }
0x1433   :  { %2079 = vtanh.f32 %v1442_v44  ;;  %v1443_v46 = vmul.f32 0.7978846, %v1441_v45 }
0x1435   :  { %2081 = vtanh.f32 %v1443_v46 }
0x143d   :  { %v2080_v47 = vpop.eup %2079 }
0x143e   :  { %v1446_v48 = vadd.f32 1.0, %v2080_v47 }
0x143f   :  { %v2082_v49 = vpop.eup %2081 }
0x1440   :  { %v1447_v52 = vadd.f32 1.0, %v2082_v49  ;;  %v1448_v53 = vmul.f32 %v1446_v48, %v1432_v50 }
0x1442   :  { %v1449_v54 = vmul.f32 %v1447_v52, %v1433_v51 }
0x1444   :  { %v1459_v55 = vpack.c.bf16 %v1449_v54, %v1448_v53 }
0x1446   :  { %1957 = vmatmul.mubr.msk.bf16.vlgmr.msra.gmra.mrb[32].mxu0 %vm97_vm2, %v1459_v55 }
0x1519   :  { %v1529_v4 = vpop.f32.mrb[32].mxu0 }
0x151a   :  { %v1530_v56 = vadd.f32 %v1748_v3, %v1529_v4  ;;  %v1958_v57 = vpop.f32.mrb[33].mxu0 }
0x151b   :  { %v1532_v58 = vpop.f32.mrb[34].mxu0 }
0x151c   :  { %v1533_v59 = vadd.f32 %v1748_v3, %v1532_v58  ;;  %v1959_v60 = vpop.f32.mrb[35].mxu0  ;;  %v1536_v61 = vadd.f32 %v1530_v56, %v1360_v22  ;;  %v1756_v22 = vld [vmem:[%s2602_s18 + $0x1] ss:$0 sm:$0xff] }
0x151e   :  { %v1542_v62 = vsel %vm209_vm7, %v1536_v61, 0.0  ;;  %v1537_v21 = vadd.f32 %v1533_v59, %v1361_v23 }
0x151f   :  { %1543 = vadd.xlane.f32.xlu1 %v1542_v62 }
0x1520   :  { %v1545_v63 = vsel %vm209_vm7, %v1537_v21, 0.0 }
0x1521   :  { %1546 = vadd.xlane.f32.xlu0 %v1545_v63 }
0x15ac   :  { %v1544_v0 = vpop.xlane.xlu1 %1543 }
0x15ad   :  { %v1548_v25 = vmul.f32 0.03125, %v1544_v0 }
0x15ae   :  { %v1547_v19 = vpop.xlane.xlu0 %1546 }
0x15af   :  { %v1550_v20 = vsub.f32 %v1536_v61, %v1548_v25  ;;  %v1549_v1 = vmul.f32 0.03125, %v1547_v19 }
0x15b1   :  { %v1551_v2 = vsub.f32 %v1537_v21, %v1549_v1  ;;  %v1552_v5 = vmul.f32 %v1550_v20, %v1550_v20 }
0x15b3   :  { %v1554_v6 = vsel %vm209_vm7, %v1552_v5, 0.0  ;;  %v1553_v7 = vmul.f32 %v1551_v2, %v1551_v2 }
0x15b4   :  { %1555 = vadd.xlane.f32.xlu1 %v1554_v6 }
0x15b5   :  { %v1557_v8 = vsel %vm209_vm7, %v1553_v7, 0.0 }
0x15b6   :  { %1558 = vadd.xlane.f32.xlu0 %v1557_v8 }
0x1641   :  { %v1556_v12 = vpop.xlane.xlu1 %1555 }
0x1642   :  { %v1560_v13 = vmul.f32 0.03125, %v1556_v12 }
0x1643   :  { %v1559_v14 = vpop.xlane.xlu0 %1558 }
0x1644   :  { %v1562_v15 = vadd.f32 1e-12, %v1560_v13  ;;  %v1561_v16 = vmul.f32 0.03125, %v1559_v14 }
0x1646   :  { %2083 = vrsqrt.f32 %v1562_v15  ;;  %v1563_v17 = vadd.f32 1e-12, %v1561_v16 }
0x1648   :  { %2085 = vrsqrt.f32 %v1563_v17 }
0x1650   :  { %v2084_v18 = vpop.eup %2083 }
0x1651   :  { %v1566_v23 = vmul.f32 %v2084_v18, %v1550_v20 }
0x1652   :  { %v2086_v24 = vpop.eup %2085 }
0x1653   :  { %v1574_v26 = vmul.f32 %v1756_v22, %v1566_v23  ;;  %v1567_v27 = vmul.f32 %v2086_v24, %v1551_v2 }
0x1655   :  { %v1575_v28 = vmul.f32 %v1756_v22, %v1567_v27  ;;  %v1582_v29 = vadd.f32 %v1757_v9, %v1574_v26 }
0x1657   :  { %v1583_v30 = vadd.f32 %v1757_v9, %v1575_v28 }
0x1659   :  { %v1588_v31 = vpack.c.bf16 %v1583_v30, %v1582_v29 }
0x165b   :  { %1965 = vmatmul.mubr.msk.bf16.vlgmr.msra.gmra.mrb[32].mxu1 %vm209_vm7, %v1588_v31 }
0x172e   :  { %v1645_v33 = vpop.f32.mrb[32].mxu1 }
0x172f   :  { %v1646_v34 = vadd.f32 %v1758_v32, %v1645_v33  ;;  %v1966_v35 = vpop.f32.mrb[33].mxu1 }
0x1730   :  { %v1648_v36 = vpop.f32.mrb[34].mxu1 }
0x1731   :  { %v1762_v37 = vmul.f32 -1.442695, %v1646_v34  ;;  %v1649_v38 = vadd.f32 %v1758_v32, %v1648_v36  ;;  %v1967_v39 = vpop.f32.mrb[35].mxu1 }
0x1733   :  { %2087 = vpow2.f32 %v1762_v37  ;;  %v1763_v40 = vmul.f32 -1.442695, %v1649_v38 }
0x1735   :  { %2089 = vpow2.f32 %v1763_v40 }
0x173d   :  { %v2088_v41 = vpop.eup %2087 }
0x173e   :  { %v1658_v42 = vadd.f32 1.0, %v2088_v41 }
0x173f   :  { %v2090_v43 = vpop.eup %2089 }
0x1740   :  { %2091 = vrcp.f32 %v1658_v42  ;;  %v1659_v44 = vadd.f32 1.0, %v2090_v43 }
0x1742   :  { %2093 = vrcp.f32 %v1659_v44 }
0x174a   :  { %v2092_v45 = vpop.eup %2091 }
0x174b   :  { %1664 = vst [vmem:[%s2606_s22] sm:$0xff] %v2092_v45 }
0x174c   :  { %v2094_v46 = vpop.eup %2093 }
0x174d   :  { %1665 = vst [vmem:[%s2606_s22 + $0x8] sm:$0xff] %v2094_v46 }

</bundles_post_ra>
